<compile_context>
chip_gen: v7x
topology: tpu7x:2x2x1
jax: 0.10.0
libtpu: 0.0.40
codegen_flags: <defaults>
</compile_context>

<pallas_src>
import functools
import math

import jax
import jax.numpy as jnp
from jax import lax
from jax.experimental import pallas as pl
from jax.experimental.pallas import tpu as pltpu


def _layer_norm(z, gamma, beta, eps=1e-5):
    mu = jnp.mean(z, axis=-1, keepdims=True)
    var = jnp.mean((z - mu) ** 2, axis=-1, keepdims=True)
    return (z - mu) * lax.rsqrt(var + eps) * gamma + beta


# ---------------------------------------------------------------------------
# Encoder kernel: one grid step == (one batch element, one encoder layer).
# ---------------------------------------------------------------------------
def bert_encoder_kernel(num_heads, has_mask, *refs):
    if has_mask:
        x_ref, vl_ref = refs[0], refs[1]
        w_refs = refs[2:14]
        out_ref, carry_ref = refs[14], refs[15]
    else:
        x_ref = refs[0]
        vl_ref = None
        w_refs = refs[1:13]
        out_ref, carry_ref = refs[13], refs[14]
    (wqkv_ref, bqkv_ref, wo_ref, bo_ref, g1_ref, be1_ref,
     w1_ref, b1_ref, w2_ref, b2_ref, g2_ref, be2_ref) = w_refs

    S, H = x_ref.shape[1], x_ref.shape[2]
    nh = num_heads
    dh = H // nh
    scale = 1.0 / math.sqrt(dh)
    l = pl.program_id(1)

    # layer 0: load this batch element's activations (bf16 -> f32 carry)
    @pl.when(l == 0)
    def _():
        carry_ref[...] = x_ref[0].astype(jnp.float32)

    x = carry_ref[...]                                         # (S, H) f32

    # ---- multi-head self attention ----
    # fused QKV projection: one (S, H) @ (H, 3H) MXU matmul
    qkv = jnp.dot(x.astype(jnp.bfloat16), wqkv_ref[0],
                  preferred_element_type=jnp.float32) + bqkv_ref[0]   # (S, 3H)
    q = (qkv[:, :H] * scale).astype(jnp.bfloat16)              # fold 1/sqrt(dh) into q
    k = qkv[:, H:2 * H].astype(jnp.bfloat16)
    v = qkv[:, 2 * H:3 * H].astype(jnp.bfloat16)

    # pack heads into the leading (batch) dim -> two batched einsums
    qh = jnp.stack([q[:, h * dh:(h + 1) * dh] for h in range(nh)], axis=0)  # (nh,S,dh)
    kh = jnp.stack([k[:, h * dh:(h + 1) * dh] for h in range(nh)], axis=0)
    vh = jnp.stack([v[:, h * dh:(h + 1) * dh] for h in range(nh)], axis=0)

    s = jnp.einsum('hqd,hkd->hqk', qh, kh,
                   preferred_element_type=jnp.float32)         # (nh, S, S)

    if has_mask:
        vl_b = vl_ref[pl.program_id(0)]
        key_ids = lax.broadcasted_iota(jnp.int32, s.shape, 2)
        s = jnp.where(key_ids < vl_b, s, -1e6)

    s = s - jnp.max(s, axis=-1, keepdims=True)
    p = jnp.exp(s)
    p = p / jnp.sum(p, axis=-1, keepdims=True)                 # exact softmax (f32)

    ctx = jnp.einsum('hqk,hkd->hqd', p.astype(jnp.bfloat16), vh,
                     preferred_element_type=jnp.float32)       # (nh, S, dh)
    # re-concatenate heads on the lane axis -> ONE K=H output projection
    ctx_cat = jnp.concatenate([ctx[h] for h in range(nh)], axis=-1)       # (S, H)
    o = jnp.dot(ctx_cat.astype(jnp.bfloat16), wo_ref[0],
                preferred_element_type=jnp.float32) + bo_ref[0]

    # TODO(synk): dropout omitted (deterministic / eval-mode forward)
    y = _layer_norm(x + o, g1_ref[0], be1_ref[0])              # AddNorm 1

    # ---- position-wise FFN ----
    h1 = jnp.maximum(
        jnp.dot(y.astype(jnp.bfloat16), w1_ref[0],
                preferred_element_type=jnp.float32) + b1_ref[0], 0.0)
    ff = jnp.dot(h1.astype(jnp.bfloat16), w2_ref[0],
                 preferred_element_type=jnp.float32) + b2_ref[0]
    new_x = _layer_norm(y + ff, g2_ref[0], be2_ref[0])         # AddNorm 2

    carry_ref[...] = new_x

    @pl.when(l == pl.num_programs(1) - 1)
    def _():
        out_ref[0] = new_x


def run_bert_encoder(x, valid_lens, blocks, num_heads):
    """x: (B, S, H) f32; blocks: dict of layer-stacked encoder weights."""
    B, S, H = x.shape
    L = blocks['wqkv'].shape[0]
    F = blocks['w1'].shape[-1]
    assert H % num_heads == 0
    has_mask = valid_lens is not None

    w_shapes = {
        'wqkv': (1, H, 3 * H), 'bqkv': (1, 1, 3 * H),
        'wo': (1, H, H), 'bo': (1, 1, H),
        'g1': (1, 1, H), 'be1': (1, 1, H),
        'w1': (1, H, F), 'b1': (1, 1, F),
        'w2': (1, F, H), 'b2': (1, 1, H),
        'g2': (1, 1, H), 'be2': (1, 1, H),
    }
    order = list(w_shapes.keys())
    layer_map = lambda b, l: (l, 0, 0)                 # stream per-layer weights
    act_map = lambda b, l: (b, 0, 0)                   # activation block per batch elem

    inputs = [x.astype(jnp.bfloat16)]                  # bf16 across the boundary
    in_specs = [pl.BlockSpec((1, S, H), act_map)]
    if has_mask:
        inputs.append(valid_lens.astype(jnp.int32).reshape(B))
        in_specs.append(pl.BlockSpec(memory_space=pltpu.MemorySpace.SMEM))
    inputs += [blocks[k] for k in order]
    in_specs += [pl.BlockSpec(w_shapes[k], layer_map) for k in order]

    out = pl.pallas_call(
        functools.partial(bert_encoder_kernel, num_heads, has_mask),
        out_shape=jax.ShapeDtypeStruct((B, S, H), jnp.float32),
        grid=(B, L),
        in_specs=in_specs,
        out_specs=pl.BlockSpec((1, S, H), act_map),
        scratch_shapes=[pltpu.VMEM((S, H), jnp.float32)],   # activation carried over layers
        compiler_params=pltpu.CompilerParams(
            dimension_semantics=("parallel", "arbitrary"),
            vmem_limit_bytes=64 * 1024 * 1024),
    )(*inputs)
    return out


# ---------------------------------------------------------------------------
# MaskLM head: Linear(H,H) -> ReLU -> LayerNorm(H) -> Linear(H,V), vocab tiled.
# ---------------------------------------------------------------------------
def mlm_head_kernel(x_ref, w1_ref, b1_ref, g_ref, be_ref, w2_ref, b2_ref,
                    out_ref, h_ref):
    @pl.when(pl.program_id(0) == 0)                    # hidden computed once, reused per tile
    def _():
        h = jnp.dot(x_ref[...].astype(jnp.bfloat16), w1_ref[...],
                    preferred_element_type=jnp.float32) + b1_ref[...]
        h = jnp.maximum(h, 0.0)
        h_ref[...] = _layer_norm(h, g_ref[...], be_ref[...])
    out_ref[...] = jnp.dot(h_ref[...].astype(jnp.bfloat16), w2_ref[...],
                           preferred_element_type=jnp.float32) + b2_ref[...]


def run_mask_lm(encoded_x, pred_positions, mlm):
    B, S, H = encoded_x.shape
    P = pred_positions.shape[1]
    V = mlm['w2'].shape[-1]
    BP = B * P

    # gather of masked positions = glue, stays in plain JAX
    batch_idx = jnp.repeat(jnp.arange(B), P)
    masked_x = encoded_x[batch_idx, pred_positions.reshape(-1)]       # (B*P, H) f32

    # lane-dense vocab tile (multiple of 128) that divides V; fall back to full V
    tn = V
    for cand in (512, 256, 128):
        if V % cand == 0:
            tn = cand
            break

    out = pl.pallas_call(
        mlm_head_kernel,
        out_shape=jax.ShapeDtypeStruct((BP, V), jnp.float32),
        grid=(V // tn,),
        in_specs=[
            pl.BlockSpec((BP, H), lambda j: (0, 0)),
            pl.BlockSpec((H, H), lambda j: (0, 0)),
            pl.BlockSpec((1, H), lambda j: (0, 0)),
            pl.BlockSpec((1, H), lambda j: (0, 0)),
            pl.BlockSpec((1, H), lambda j: (0, 0)),
            pl.BlockSpec((H, tn), lambda j: (0, j)),    # stream vocab slabs of w2
            pl.BlockSpec((1, tn), lambda j: (0, j)),
        ],
        out_specs=pl.BlockSpec((BP, tn), lambda j: (0, j)),
        scratch_shapes=[pltpu.VMEM((BP, H), jnp.float32)],
        compiler_params=pltpu.CompilerParams(
            dimension_semantics=("arbitrary",),
            vmem_limit_bytes=64 * 1024 * 1024),
    )(masked_x, mlm['w1'], mlm['b1'], mlm['gamma'], mlm['beta'],
      mlm['w2'], mlm['b2'])
    return out.reshape(B, P, V)


# ---------------------------------------------------------------------------
# Params / forward glue
# ---------------------------------------------------------------------------
def init_params(key, vocab_size, num_hiddens, ffn_num_hiddens, num_layers, max_len):
    H, F, V, L = num_hiddens, ffn_num_hiddens, vocab_size, num_layers
    ks = jax.random.split(key, 8 + num_layers)

    def w(k, shape):  # bf16 matmul weights, f32 accumulation in-kernel
        return (0.02 * jax.random.normal(k, shape, jnp.float32)).astype(jnp.bfloat16)

    params = {
        'token_embedding': 0.02 * jax.random.normal(ks[0], (V, H), jnp.float32),
        'segment_embedding': 0.02 * jax.random.normal(ks[1], (2, H), jnp.float32),
        'pos_embedding': jax.random.normal(ks[2], (1, max_len, H), jnp.float32),
    }
    wqkv, wo, w1, w2 = [], [], [], []
    for l in range(num_layers):
        lk = jax.random.split(ks[3 + l], 4)
        wqkv.append(w(lk[0], (H, 3 * H)))              # fused Q/K/V projection
        wo.append(w(lk[1], (H, H)))
        w1.append(w(lk[2], (H, F)))
        w2.append(w(lk[3], (F, H)))
    params['blocks'] = {
        'wqkv': jnp.stack(wqkv), 'bqkv': jnp.zeros((L, 1, 3 * H), jnp.float32),
        'wo': jnp.stack(wo), 'bo': jnp.zeros((L, 1, H), jnp.float32),
        'g1': jnp.ones((L, 1, H), jnp.float32), 'be1': jnp.zeros((L, 1, H), jnp.float32),
        'w1': jnp.stack(w1), 'b1': jnp.zeros((L, 1, F), jnp.float32),
        'w2': jnp.stack(w2), 'b2': jnp.zeros((L, 1, H), jnp.float32),
        'g2': jnp.ones((L, 1, H), jnp.float32), 'be2': jnp.zeros((L, 1, H), jnp.float32),
    }
    params['mlm'] = {
        'w1': w(ks[3 + num_layers], (H, H)), 'b1': jnp.zeros((1, H), jnp.float32),
        'gamma': jnp.ones((1, H), jnp.float32), 'beta': jnp.zeros((1, H), jnp.float32),
        'w2': w(ks[4 + num_layers], (H, V)), 'b2': jnp.zeros((1, V), jnp.float32),
    }
    return params


def bert_encoder_forward(tokens, segments, valid_lens, params, num_heads):
    # embedding lookups (gathers) = glue, stay in plain JAX
    X = params['token_embedding'][tokens] + params['segment_embedding'][segments]
    X = X + params['pos_embedding'][:, :tokens.shape[1], :]
    return run_bert_encoder(X, valid_lens, params['blocks'], num_heads)


@functools.partial(jax.jit, static_argnames=('num_heads',))
def mask_lm_forward(tokens, segments, mlm_positions, params, num_heads):
    encoded_X = bert_encoder_forward(tokens, segments, None, params, num_heads)
    mlm_Y_hat = run_mask_lm(encoded_X, mlm_positions, params['mlm'])
    return encoded_X, mlm_Y_hat


if __name__ == "__main__":
    vocab_size = 128
    num_hiddens = 32
    ffn_num_hiddens = 64
    num_heads = 4
    num_layers = 2
    max_len = 64
    batch, seq = 2, 8

    key = jax.random.PRNGKey(0)
    k_tok, k_par = jax.random.split(key)

    tokens = jax.random.randint(k_tok, (batch, seq), 0, vocab_size, dtype=jnp.int32)
    segments = jnp.array([[0, 0, 0, 0, 1, 1, 1, 1],
                          [0, 0, 0, 1, 1, 1, 1, 1]], dtype=jnp.int32)
    mlm_positions = jnp.array([[1, 5, 2], [6, 1, 5]], dtype=jnp.int32)

    params = init_params(k_par, vocab_size, num_hiddens, ffn_num_hiddens,
                         num_layers, max_len)

    encoded_X, mlm_Y_hat = mask_lm_forward(tokens, segments, mlm_positions,
                                           params, num_heads)
    encoded_X = jax.block_until_ready(encoded_X)
    mlm_Y_hat = jax.block_until_ready(mlm_Y_hat)

    assert encoded_X.shape == (batch, seq, num_hiddens)
    assert mlm_Y_hat.shape == (batch, mlm_positions.shape[1], vocab_size)
    assert bool(jnp.all(jnp.isfinite(encoded_X)))
    assert bool(jnp.all(jnp.isfinite(mlm_Y_hat)))
    print("KERNEL_OK")
</pallas_src>

<mosaic_0001>
module attributes {stable_mosaic.version = 11 : i64} {
  func.func @mlm_head_kernel(%arg0: i32, %arg1: memref<6x32xf32, #tpu.memory_space<vmem>>, %arg2: memref<32x32xbf16, #tpu.memory_space<vmem>>, %arg3: memref<1x32xf32, #tpu.memory_space<vmem>>, %arg4: memref<1x32xf32, #tpu.memory_space<vmem>>, %arg5: memref<1x32xf32, #tpu.memory_space<vmem>>, %arg6: memref<32x128xbf16, #tpu.memory_space<vmem>>, %arg7: memref<1x128xf32, #tpu.memory_space<vmem>>, %arg8: memref<6x128xf32, #tpu.memory_space<vmem>>, %arg9: memref<6x32xf32, #tpu.memory_space<vmem>>) attributes {dimension_semantics = [#tpu.dimension_semantics<arbitrary>], iteration_bounds = array<i64: 1>, scalar_prefetch = 0 : i64, scratch_operands = 1 : i64, tpu.core_type = #tpu.core_type<tc>, window_params = [{pipeline_mode = #tpu.pipeline_mode<synchronous>, transform_indices = @transform_0, window_bounds = array<i64: 6, 32>}, {pipeline_mode = #tpu.pipeline_mode<synchronous>, transform_indices = @transform_1, window_bounds = array<i64: 32, 32>}, {pipeline_mode = #tpu.pipeline_mode<synchronous>, transform_indices = @transform_2, window_bounds = array<i64: 1, 32>}, {pipeline_mode = #tpu.pipeline_mode<synchronous>, transform_indices = @transform_3, window_bounds = array<i64: 1, 32>}, {pipeline_mode = #tpu.pipeline_mode<synchronous>, transform_indices = @transform_4, window_bounds = array<i64: 1, 32>}, {transform_indices = @transform_5, window_bounds = array<i64: 32, 128>}, {transform_indices = @transform_6, window_bounds = array<i64: 1, 128>}, {transform_indices = @transform_7, window_bounds = array<i64: 6, 128>}]} {
    %c0_i32 = arith.constant 0 : i32
    %0 = arith.cmpi eq, %arg0, %c0_i32 : i32
    %1 = arith.extui %0 : i1 to i32
    %c0_i32_0 = arith.constant 0 : i32
    %2 = arith.cmpi ne, %1, %c0_i32_0 : i32
    scf.if %2 {
      %c0_8 = arith.constant 0 : index
      %c0_9 = arith.constant 0 : index
      %11 = vector.load %arg1[%c0_8, %c0_9] : memref<6x32xf32, #tpu.memory_space<vmem>>, vector<6x32xf32>
      %12 = arith.truncf %11 : vector<6x32xf32> to vector<6x32xbf16>
      %c0_10 = arith.constant 0 : index
      %c0_11 = arith.constant 0 : index
      %13 = vector.load %arg2[%c0_10, %c0_11] : memref<32x32xbf16, #tpu.memory_space<vmem>>, vector<32x32xbf16>
      %cst_12 = arith.constant dense<0.000000e+00> : vector<6x32xf32>
      %14 = tpu.matmul %12, %13, %cst_12 {dimension_numbers = #tpu.dot_dimension_numbers<[1], [0], [0], [1], [0, 0, 1, 1], [], []>} : vector<6x32xbf16>, vector<32x32xbf16>, vector<6x32xf32> -> vector<6x32xf32>
      %c0_13 = arith.constant 0 : index
      %c0_14 = arith.constant 0 : index
      %15 = vector.load %arg3[%c0_13, %c0_14] : memref<1x32xf32, #tpu.memory_space<vmem>>, vector<1x32xf32>
      %16 = vector.broadcast %15 : vector<1x32xf32> to vector<6x32xf32>
      %17 = arith.addf %14, %16 : vector<6x32xf32>
      %cst_15 = arith.constant 0.000000e+00 : f32
      %18 = vector.broadcast %cst_15 : f32 to vector<6x32xf32>
      %19 = arith.maximumf %17, %18 : vector<6x32xf32>
      %c0_16 = arith.constant 0 : index
      %c0_17 = arith.constant 0 : index
      %20 = vector.load %arg4[%c0_16, %c0_17] : memref<1x32xf32, #tpu.memory_space<vmem>>, vector<1x32xf32>
      %c0_18 = arith.constant 0 : index
      %c0_19 = arith.constant 0 : index
      %21 = vector.load %arg5[%c0_18, %c0_19] : memref<1x32xf32, #tpu.memory_space<vmem>>, vector<1x32xf32>
      %cst_20 = arith.constant dense<0.000000e+00> : vector<6xf32>
      %22 = vector.multi_reduction <add>, %19, %cst_20 [1] : vector<6x32xf32> to vector<6xf32>
      %23 = vector.shape_cast %22 : vector<6xf32> to vector<6x1xf32>
      %cst_21 = arith.constant 3.200000e+01 : f32
      %24 = vector.broadcast %cst_21 : f32 to vector<6x1xf32>
      %25 = arith.divf %23, %24 : vector<6x1xf32>
      %26 = vector.broadcast %25 : vector<6x1xf32> to vector<6x32xf32>
      %27 = arith.subf %19, %26 : vector<6x32xf32>
      %28 = arith.mulf %27, %27 : vector<6x32xf32>
      %cst_22 = arith.constant dense<0.000000e+00> : vector<6xf32>
      %29 = vector.multi_reduction <add>, %28, %cst_22 [1] : vector<6x32xf32> to vector<6xf32>
      %30 = vector.shape_cast %29 : vector<6xf32> to vector<6x1xf32>
      %cst_23 = arith.constant 3.200000e+01 : f32
      %31 = vector.broadcast %cst_23 : f32 to vector<6x1xf32>
      %32 = arith.divf %30, %31 : vector<6x1xf32>
      %33 = vector.broadcast %25 : vector<6x1xf32> to vector<6x32xf32>
      %34 = arith.subf %19, %33 : vector<6x32xf32>
      %cst_24 = arith.constant 9.99999974E-6 : f32
      %35 = vector.broadcast %cst_24 : f32 to vector<6x1xf32>
      %36 = arith.addf %32, %35 : vector<6x1xf32>
      %37 = math.rsqrt %36 : vector<6x1xf32>
      %38 = vector.broadcast %37 : vector<6x1xf32> to vector<6x32xf32>
      %39 = arith.mulf %34, %38 : vector<6x32xf32>
      %40 = vector.broadcast %20 : vector<1x32xf32> to vector<6x32xf32>
      %41 = arith.mulf %39, %40 : vector<6x32xf32>
      %42 = vector.broadcast %21 : vector<1x32xf32> to vector<6x32xf32>
      %43 = arith.addf %41, %42 : vector<6x32xf32>
      %c0_25 = arith.constant 0 : index
      %c0_26 = arith.constant 0 : index
      %44 = vector.load %arg9[%c0_25, %c0_26] : memref<6x32xf32, #tpu.memory_space<vmem>>, vector<6x32xf32>
      tpu.vector_store %arg9[%c0_25, %c0_26], %43 {strides = array<i32>} : memref<6x32xf32, #tpu.memory_space<vmem>>, vector<6x32xf32>,
    } else {
    }
    %c0 = arith.constant 0 : index
    %c0_1 = arith.constant 0 : index
    %3 = vector.load %arg9[%c0, %c0_1] : memref<6x32xf32, #tpu.memory_space<vmem>>, vector<6x32xf32>
    %4 = arith.truncf %3 : vector<6x32xf32> to vector<6x32xbf16>
    %c0_2 = arith.constant 0 : index
    %c0_3 = arith.constant 0 : index
    %5 = vector.load %arg6[%c0_2, %c0_3] : memref<32x128xbf16, #tpu.memory_space<vmem>>, vector<32x128xbf16>
    %cst = arith.constant dense<0.000000e+00> : vector<6x128xf32>
    %6 = tpu.matmul %4, %5, %cst {dimension_numbers = #tpu.dot_dimension_numbers<[1], [0], [0], [1], [0, 0, 1, 1], [], []>} : vector<6x32xbf16>, vector<32x128xbf16>, vector<6x128xf32> -> vector<6x128xf32>
    %c0_4 = arith.constant 0 : index
    %c0_5 = arith.constant 0 : index
    %7 = vector.load %arg7[%c0_4, %c0_5] : memref<1x128xf32, #tpu.memory_space<vmem>>, vector<1x128xf32>
    %8 = vector.broadcast %7 : vector<1x128xf32> to vector<6x128xf32>
    %9 = arith.addf %6, %8 : vector<6x128xf32>
    %c0_6 = arith.constant 0 : index
    %c0_7 = arith.constant 0 : index
    %10 = vector.load %arg8[%c0_6, %c0_7] : memref<6x128xf32, #tpu.memory_space<vmem>>, vector<6x128xf32>
    tpu.vector_store %arg8[%c0_6, %c0_7], %9 {strides = array<i32>} : memref<6x128xf32, #tpu.memory_space<vmem>>, vector<6x128xf32>,
    return
  }
  func.func @transform_0(%arg0: i32) -> (i32, i32) {
    %c0_i32 = arith.constant 0 : i32
    %c0_i32_0 = arith.constant 0 : i32
    %c0_i32_1 = arith.constant 0 : i32
    return %c0_i32, %c0_i32_0 : i32, i32
  }
  func.func @transform_1(%arg0: i32) -> (i32, i32) {
    %c0_i32 = arith.constant 0 : i32
    %c0_i32_0 = arith.constant 0 : i32
    %c0_i32_1 = arith.constant 0 : i32
    return %c0_i32, %c0_i32_0 : i32, i32
  }
  func.func @transform_2(%arg0: i32) -> (i32, i32) {
    %c0_i32 = arith.constant 0 : i32
    %c0_i32_0 = arith.constant 0 : i32
    %c0_i32_1 = arith.constant 0 : i32
    return %c0_i32, %c0_i32_0 : i32, i32
  }
  func.func @transform_3(%arg0: i32) -> (i32, i32) {
    %c0_i32 = arith.constant 0 : i32
    %c0_i32_0 = arith.constant 0 : i32
    %c0_i32_1 = arith.constant 0 : i32
    return %c0_i32, %c0_i32_0 : i32, i32
  }
  func.func @transform_4(%arg0: i32) -> (i32, i32) {
    %c0_i32 = arith.constant 0 : i32
    %c0_i32_0 = arith.constant 0 : i32
    %c0_i32_1 = arith.constant 0 : i32
    return %c0_i32, %c0_i32_0 : i32, i32
  }
  func.func @transform_5(%arg0: i32) -> (i32, i32) {
    %c0_i32 = arith.constant 0 : i32
    %c0_i32_0 = arith.constant 0 : i32
    return %c0_i32, %arg0 : i32, i32
  }
  func.func @transform_6(%arg0: i32) -> (i32, i32) {
    %c0_i32 = arith.constant 0 : i32
    %c0_i32_0 = arith.constant 0 : i32
    return %c0_i32, %arg0 : i32, i32
  }
  func.func @transform_7(%arg0: i32) -> (i32, i32) {
    %c0_i32 = arith.constant 0 : i32
    %c0_i32_0 = arith.constant 0 : i32
    return %c0_i32, %arg0 : i32, i32
  }
}

module attributes {stable_mosaic.version = 11 : i64} {
  func.func @bert_encoder_kernel(%arg0: i32, %arg1: i32, %arg2: memref<1x8x32xbf16, #tpu.memory_space<vmem>>, %arg3: memref<1x32x96xbf16, #tpu.memory_space<vmem>>, %arg4: memref<1x1x96xf32, #tpu.memory_space<vmem>>, %arg5: memref<1x32x32xbf16, #tpu.memory_space<vmem>>, %arg6: memref<1x1x32xf32, #tpu.memory_space<vmem>>, %arg7: memref<1x1x32xf32, #tpu.memory_space<vmem>>, %arg8: memref<1x1x32xf32, #tpu.memory_space<vmem>>, %arg9: memref<1x32x64xbf16, #tpu.memory_space<vmem>>, %arg10: memref<1x1x64xf32, #tpu.memory_space<vmem>>, %arg11: memref<1x64x32xbf16, #tpu.memory_space<vmem>>, %arg12: memref<1x1x32xf32, #tpu.memory_space<vmem>>, %arg13: memref<1x1x32xf32, #tpu.memory_space<vmem>>, %arg14: memref<1x1x32xf32, #tpu.memory_space<vmem>>, %arg15: memref<1x8x32xf32, #tpu.memory_space<vmem>>, %arg16: memref<8x32xf32, #tpu.memory_space<vmem>>) attributes {dimension_semantics = [#tpu.dimension_semantics<parallel>, #tpu.dimension_semantics<arbitrary>], iteration_bounds = array<i64: 2, 2>, scalar_prefetch = 0 : i64, scratch_operands = 1 : i64, tpu.core_type = #tpu.core_type<tc>, window_params = [{transform_indices = @transform_0, window_bounds = array<i64: 1, 8, 32>}, {transform_indices = @transform_1, window_bounds = array<i64: 1, 32, 96>}, {transform_indices = @transform_2, window_bounds = array<i64: 1, 1, 96>}, {transform_indices = @transform_3, window_bounds = array<i64: 1, 32, 32>}, {transform_indices = @transform_4, window_bounds = array<i64: 1, 1, 32>}, {transform_indices = @transform_5, window_bounds = array<i64: 1, 1, 32>}, {transform_indices = @transform_6, window_bounds = array<i64: 1, 1, 32>}, {transform_indices = @transform_7, window_bounds = array<i64: 1, 32, 64>}, {transform_indices = @transform_8, window_bounds = array<i64: 1, 1, 64>}, {transform_indices = @transform_9, window_bounds = array<i64: 1, 64, 32>}, {transform_indices = @transform_10, window_bounds = array<i64: 1, 1, 32>}, {transform_indices = @transform_11, window_bounds = array<i64: 1, 1, 32>}, {transform_indices = @transform_12, window_bounds = array<i64: 1, 1, 32>}, {transform_indices = @transform_13, window_bounds = array<i64: 1, 8, 32>}]} {
    %c0_i32 = arith.constant 0 : i32
    %0 = arith.cmpi eq, %arg1, %c0_i32 : i32
    %1 = arith.extui %0 : i1 to i32
    %c0_i32_0 = arith.constant 0 : i32
    %2 = arith.cmpi ne, %1, %c0_i32_0 : i32
    scf.if %2 {
      %c0_60 = arith.constant 0 : index
      %c0_61 = arith.constant 0 : index
      %c0_62 = arith.constant 0 : index
      %152 = vector.load %arg2[%c0_60, %c0_61, %c0_62] : memref<1x8x32xbf16, #tpu.memory_space<vmem>>, vector<1x8x32xbf16>
      %153 = vector.shape_cast %152 : vector<1x8x32xbf16> to vector<8x32xbf16>
      %154 = arith.extf %153 : vector<8x32xbf16> to vector<8x32xf32>
      %c0_63 = arith.constant 0 : index
      %c0_64 = arith.constant 0 : index
      %155 = vector.load %arg16[%c0_63, %c0_64] : memref<8x32xf32, #tpu.memory_space<vmem>>, vector<8x32xf32>
      tpu.vector_store %arg16[%c0_63, %c0_64], %154 {strides = array<i32>} : memref<8x32xf32, #tpu.memory_space<vmem>>, vector<8x32xf32>,
    } else {
    }
    %c0 = arith.constant 0 : index
    %c0_1 = arith.constant 0 : index
    %3 = vector.load %arg16[%c0, %c0_1] : memref<8x32xf32, #tpu.memory_space<vmem>>, vector<8x32xf32>
    %4 = arith.truncf %3 : vector<8x32xf32> to vector<8x32xbf16>
    %c0_2 = arith.constant 0 : index
    %c0_3 = arith.constant 0 : index
    %c0_4 = arith.constant 0 : index
    %5 = vector.load %arg3[%c0_2, %c0_3, %c0_4] : memref<1x32x96xbf16, #tpu.memory_space<vmem>>, vector<1x32x96xbf16>
    %6 = vector.shape_cast %5 : vector<1x32x96xbf16> to vector<32x96xbf16>
    %cst = arith.constant dense<0.000000e+00> : vector<8x96xf32>
    %7 = tpu.matmul %4, %6, %cst {dimension_numbers = #tpu.dot_dimension_numbers<[1], [0], [0], [1], [0, 0, 1, 1], [], []>} : vector<8x32xbf16>, vector<32x96xbf16>, vector<8x96xf32> -> vector<8x96xf32>
    %c0_5 = arith.constant 0 : index
    %c0_6 = arith.constant 0 : index
    %c0_7 = arith.constant 0 : index
    %8 = vector.load %arg4[%c0_5, %c0_6, %c0_7] : memref<1x1x96xf32, #tpu.memory_space<vmem>>, vector<1x1x96xf32>
    %9 = vector.shape_cast %8 : vector<1x1x96xf32> to vector<1x96xf32>
    %10 = vector.broadcast %9 : vector<1x96xf32> to vector<8x96xf32>
    %11 = arith.addf %7, %10 : vector<8x96xf32>
    %12 = vector.extract_strided_slice %11 {offsets = [0, 0], sizes = [8, 32], strides = [1, 1]} : vector<8x96xf32> to vector<8x32xf32>
    %cst_8 = arith.constant 0.353553385 : f32
    %13 = vector.broadcast %cst_8 : f32 to vector<8x32xf32>
    %14 = arith.mulf %12, %13 : vector<8x32xf32>
    %15 = arith.truncf %14 : vector<8x32xf32> to vector<8x32xbf16>
    %16 = vector.extract_strided_slice %11 {offsets = [0, 32], sizes = [8, 32], strides = [1, 1]} : vector<8x96xf32> to vector<8x32xf32>
    %17 = arith.truncf %16 : vector<8x32xf32> to vector<8x32xbf16>
    %18 = vector.extract_strided_slice %11 {offsets = [0, 64], sizes = [8, 32], strides = [1, 1]} : vector<8x96xf32> to vector<8x32xf32>
    %19 = arith.truncf %18 : vector<8x32xf32> to vector<8x32xbf16>
    %20 = vector.extract_strided_slice %15 {offsets = [0, 0], sizes = [8, 8], strides = [1, 1]} : vector<8x32xbf16> to vector<8x8xbf16>
    %21 = vector.extract_strided_slice %15 {offsets = [0, 8], sizes = [8, 8], strides = [1, 1]} : vector<8x32xbf16> to vector<8x8xbf16>
    %22 = vector.extract_strided_slice %15 {offsets = [0, 16], sizes = [8, 8], strides = [1, 1]} : vector<8x32xbf16> to vector<8x8xbf16>
    %23 = vector.extract_strided_slice %15 {offsets = [0, 24], sizes = [8, 8], strides = [1, 1]} : vector<8x32xbf16> to vector<8x8xbf16>
    %24 = vector.shape_cast %20 : vector<8x8xbf16> to vector<1x8x8xbf16>
    %25 = vector.shape_cast %21 : vector<8x8xbf16> to vector<1x8x8xbf16>
    %26 = vector.shape_cast %22 : vector<8x8xbf16> to vector<1x8x8xbf16>
    %27 = vector.shape_cast %23 : vector<8x8xbf16> to vector<1x8x8xbf16>
    %28 = tpu.concatenate %24, %25, %26, %27 in 0 : vector<1x8x8xbf16>, vector<1x8x8xbf16>, vector<1x8x8xbf16>, vector<1x8x8xbf16> -> vector<4x8x8xbf16>
    %29 = vector.extract_strided_slice %17 {offsets = [0, 0], sizes = [8, 8], strides = [1, 1]} : vector<8x32xbf16> to vector<8x8xbf16>
    %30 = vector.extract_strided_slice %17 {offsets = [0, 8], sizes = [8, 8], strides = [1, 1]} : vector<8x32xbf16> to vector<8x8xbf16>
    %31 = vector.extract_strided_slice %17 {offsets = [0, 16], sizes = [8, 8], strides = [1, 1]} : vector<8x32xbf16> to vector<8x8xbf16>
    %32 = vector.extract_strided_slice %17 {offsets = [0, 24], sizes = [8, 8], strides = [1, 1]} : vector<8x32xbf16> to vector<8x8xbf16>
    %33 = vector.shape_cast %29 : vector<8x8xbf16> to vector<1x8x8xbf16>
    %34 = vector.shape_cast %30 : vector<8x8xbf16> to vector<1x8x8xbf16>
    %35 = vector.shape_cast %31 : vector<8x8xbf16> to vector<1x8x8xbf16>
    %36 = vector.shape_cast %32 : vector<8x8xbf16> to vector<1x8x8xbf16>
    %37 = tpu.concatenate %33, %34, %35, %36 in 0 : vector<1x8x8xbf16>, vector<1x8x8xbf16>, vector<1x8x8xbf16>, vector<1x8x8xbf16> -> vector<4x8x8xbf16>
    %38 = vector.extract_strided_slice %19 {offsets = [0, 0], sizes = [8, 8], strides = [1, 1]} : vector<8x32xbf16> to vector<8x8xbf16>
    %39 = vector.extract_strided_slice %19 {offsets = [0, 8], sizes = [8, 8], strides = [1, 1]} : vector<8x32xbf16> to vector<8x8xbf16>
    %40 = vector.extract_strided_slice %19 {offsets = [0, 16], sizes = [8, 8], strides = [1, 1]} : vector<8x32xbf16> to vector<8x8xbf16>
    %41 = vector.extract_strided_slice %19 {offsets = [0, 24], sizes = [8, 8], strides = [1, 1]} : vector<8x32xbf16> to vector<8x8xbf16>
    %42 = vector.shape_cast %38 : vector<8x8xbf16> to vector<1x8x8xbf16>
    %43 = vector.shape_cast %39 : vector<8x8xbf16> to vector<1x8x8xbf16>
    %44 = vector.shape_cast %40 : vector<8x8xbf16> to vector<1x8x8xbf16>
    %45 = vector.shape_cast %41 : vector<8x8xbf16> to vector<1x8x8xbf16>
    %46 = tpu.concatenate %42, %43, %44, %45 in 0 : vector<1x8x8xbf16>, vector<1x8x8xbf16>, vector<1x8x8xbf16>, vector<1x8x8xbf16> -> vector<4x8x8xbf16>
    "tpu.trace_start"() <{level = 10 : i32, message = "hqd,hkd->hqk"}> : () -> ()
    %cst_9 = arith.constant dense<0.000000e+00> : vector<4x8x8xf32>
    %47 = tpu.matmul %28, %37, %cst_9 {dimension_numbers = #tpu.dot_dimension_numbers<[2], [2], [1], [1], [0, 0, 0, 1, 1, 1], [0], [0]>} : vector<4x8x8xbf16>, vector<4x8x8xbf16>, vector<4x8x8xf32> -> vector<4x8x8xf32>
    "tpu.trace_stop"() : () -> ()
    %cst_10 = arith.constant dense<0xFF800000> : vector<4x8xf32>
    %48 = vector.multi_reduction <maximumf>, %47, %cst_10 [2] : vector<4x8x8xf32> to vector<4x8xf32>
    %49 = vector.shape_cast %48 : vector<4x8xf32> to vector<4x8x1xf32>
    %50 = vector.broadcast %49 : vector<4x8x1xf32> to vector<4x8x8xf32>
    %51 = arith.subf %47, %50 : vector<4x8x8xf32>
    %52 = math.exp %51 : vector<4x8x8xf32>
    %cst_11 = arith.constant dense<0.000000e+00> : vector<4x8xf32>
    %53 = vector.multi_reduction <add>, %52, %cst_11 [2] : vector<4x8x8xf32> to vector<4x8xf32>
    %54 = vector.shape_cast %53 : vector<4x8xf32> to vector<4x8x1xf32>
    %55 = vector.broadcast %54 : vector<4x8x1xf32> to vector<4x8x8xf32>
    %56 = arith.divf %52, %55 : vector<4x8x8xf32>
    %57 = arith.truncf %56 : vector<4x8x8xf32> to vector<4x8x8xbf16>
    "tpu.trace_start"() <{level = 10 : i32, message = "hqk,hkd->hqd"}> : () -> ()
    %cst_12 = arith.constant dense<0.000000e+00> : vector<4x8x8xf32>
    %58 = tpu.matmul %57, %46, %cst_12 {dimension_numbers = #tpu.dot_dimension_numbers<[2], [1], [1], [2], [0, 0, 0, 1, 1, 2], [0], [0]>} : vector<4x8x8xbf16>, vector<4x8x8xbf16>, vector<4x8x8xf32> -> vector<4x8x8xf32>
    "tpu.trace_stop"() : () -> ()
    %59 = vector.extract_strided_slice %58 {offsets = [0, 0, 0], sizes = [1, 8, 8], strides = [1, 1, 1]} : vector<4x8x8xf32> to vector<1x8x8xf32>
    %60 = vector.shape_cast %59 : vector<1x8x8xf32> to vector<8x8xf32>
    %61 = vector.extract_strided_slice %58 {offsets = [1, 0, 0], sizes = [1, 8, 8], strides = [1, 1, 1]} : vector<4x8x8xf32> to vector<1x8x8xf32>
    %62 = vector.shape_cast %61 : vector<1x8x8xf32> to vector<8x8xf32>
    %63 = vector.extract_strided_slice %58 {offsets = [2, 0, 0], sizes = [1, 8, 8], strides = [1, 1, 1]} : vector<4x8x8xf32> to vector<1x8x8xf32>
    %64 = vector.shape_cast %63 : vector<1x8x8xf32> to vector<8x8xf32>
    %65 = vector.extract_strided_slice %58 {offsets = [3, 0, 0], sizes = [1, 8, 8], strides = [1, 1, 1]} : vector<4x8x8xf32> to vector<1x8x8xf32>
    %66 = vector.shape_cast %65 : vector<1x8x8xf32> to vector<8x8xf32>
    %67 = tpu.concatenate %60, %62, %64, %66 in 1 : vector<8x8xf32>, vector<8x8xf32>, vector<8x8xf32>, vector<8x8xf32> -> vector<8x32xf32>
    %68 = arith.truncf %67 : vector<8x32xf32> to vector<8x32xbf16>
    %c0_13 = arith.constant 0 : index
    %c0_14 = arith.constant 0 : index
    %c0_15 = arith.constant 0 : index
    %69 = vector.load %arg5[%c0_13, %c0_14, %c0_15] : memref<1x32x32xbf16, #tpu.memory_space<vmem>>, vector<1x32x32xbf16>
    %70 = vector.shape_cast %69 : vector<1x32x32xbf16> to vector<32x32xbf16>
    %cst_16 = arith.constant dense<0.000000e+00> : vector<8x32xf32>
    %71 = tpu.matmul %68, %70, %cst_16 {dimension_numbers = #tpu.dot_dimension_numbers<[1], [0], [0], [1], [0, 0, 1, 1], [], []>} : vector<8x32xbf16>, vector<32x32xbf16>, vector<8x32xf32> -> vector<8x32xf32>
    %c0_17 = arith.constant 0 : index
    %c0_18 = arith.constant 0 : index
    %c0_19 = arith.constant 0 : index
    %72 = vector.load %arg6[%c0_17, %c0_18, %c0_19] : memref<1x1x32xf32, #tpu.memory_space<vmem>>, vector<1x1x32xf32>
    %73 = vector.shape_cast %72 : vector<1x1x32xf32> to vector<1x32xf32>
    %74 = vector.broadcast %73 : vector<1x32xf32> to vector<8x32xf32>
    %75 = arith.addf %71, %74 : vector<8x32xf32>
    %76 = arith.addf %3, %75 : vector<8x32xf32>
    %c0_20 = arith.constant 0 : index
    %c0_21 = arith.constant 0 : index
    %c0_22 = arith.constant 0 : index
    %77 = vector.load %arg7[%c0_20, %c0_21, %c0_22] : memref<1x1x32xf32, #tpu.memory_space<vmem>>, vector<1x1x32xf32>
    %78 = vector.shape_cast %77 : vector<1x1x32xf32> to vector<1x32xf32>
    %c0_23 = arith.constant 0 : index
    %c0_24 = arith.constant 0 : index
    %c0_25 = arith.constant 0 : index
    %79 = vector.load %arg8[%c0_23, %c0_24, %c0_25] : memref<1x1x32xf32, #tpu.memory_space<vmem>>, vector<1x1x32xf32>
    %80 = vector.shape_cast %79 : vector<1x1x32xf32> to vector<1x32xf32>
    %cst_26 = arith.constant dense<0.000000e+00> : vector<8xf32>
    %81 = vector.multi_reduction <add>, %76, %cst_26 [1] : vector<8x32xf32> to vector<8xf32>
    %82 = vector.shape_cast %81 : vector<8xf32> to vector<8x1xf32>
    %cst_27 = arith.constant 3.200000e+01 : f32
    %83 = vector.broadcast %cst_27 : f32 to vector<8x1xf32>
    %84 = arith.divf %82, %83 : vector<8x1xf32>
    %85 = vector.broadcast %84 : vector<8x1xf32> to vector<8x32xf32>
    %86 = arith.subf %76, %85 : vector<8x32xf32>
    %87 = arith.mulf %86, %86 : vector<8x32xf32>
    %cst_28 = arith.constant dense<0.000000e+00> : vector<8xf32>
    %88 = vector.multi_reduction <add>, %87, %cst_28 [1] : vector<8x32xf32> to vector<8xf32>
    %89 = vector.shape_cast %88 : vector<8xf32> to vector<8x1xf32>
    %cst_29 = arith.constant 3.200000e+01 : f32
    %90 = vector.broadcast %cst_29 : f32 to vector<8x1xf32>
    %91 = arith.divf %89, %90 : vector<8x1xf32>
    %92 = vector.broadcast %84 : vector<8x1xf32> to vector<8x32xf32>
    %93 = arith.subf %76, %92 : vector<8x32xf32>
    %cst_30 = arith.constant 9.99999974E-6 : f32
    %94 = vector.broadcast %cst_30 : f32 to vector<8x1xf32>
    %95 = arith.addf %91, %94 : vector<8x1xf32>
    %96 = math.rsqrt %95 : vector<8x1xf32>
    %97 = vector.broadcast %96 : vector<8x1xf32> to vector<8x32xf32>
    %98 = arith.mulf %93, %97 : vector<8x32xf32>
    %99 = vector.broadcast %78 : vector<1x32xf32> to vector<8x32xf32>
    %100 = arith.mulf %98, %99 : vector<8x32xf32>
    %101 = vector.broadcast %80 : vector<1x32xf32> to vector<8x32xf32>
    %102 = arith.addf %100, %101 : vector<8x32xf32>
    %103 = arith.truncf %102 : vector<8x32xf32> to vector<8x32xbf16>
    %c0_31 = arith.constant 0 : index
    %c0_32 = arith.constant 0 : index
    %c0_33 = arith.constant 0 : index
    %104 = vector.load %arg9[%c0_31, %c0_32, %c0_33] : memref<1x32x64xbf16, #tpu.memory_space<vmem>>, vector<1x32x64xbf16>
    %105 = vector.shape_cast %104 : vector<1x32x64xbf16> to vector<32x64xbf16>
    %cst_34 = arith.constant dense<0.000000e+00> : vector<8x64xf32>
    %106 = tpu.matmul %103, %105, %cst_34 {dimension_numbers = #tpu.dot_dimension_numbers<[1], [0], [0], [1], [0, 0, 1, 1], [], []>} : vector<8x32xbf16>, vector<32x64xbf16>, vector<8x64xf32> -> vector<8x64xf32>
    %c0_35 = arith.constant 0 : index
    %c0_36 = arith.constant 0 : index
    %c0_37 = arith.constant 0 : index
    %107 = vector.load %arg10[%c0_35, %c0_36, %c0_37] : memref<1x1x64xf32, #tpu.memory_space<vmem>>, vector<1x1x64xf32>
    %108 = vector.shape_cast %107 : vector<1x1x64xf32> to vector<1x64xf32>
    %109 = vector.broadcast %108 : vector<1x64xf32> to vector<8x64xf32>
    %110 = arith.addf %106, %109 : vector<8x64xf32>
    %cst_38 = arith.constant 0.000000e+00 : f32
    %111 = vector.broadcast %cst_38 : f32 to vector<8x64xf32>
    %112 = arith.maximumf %110, %111 : vector<8x64xf32>
    %113 = arith.truncf %112 : vector<8x64xf32> to vector<8x64xbf16>
    %c0_39 = arith.constant 0 : index
    %c0_40 = arith.constant 0 : index
    %c0_41 = arith.constant 0 : index
    %114 = vector.load %arg11[%c0_39, %c0_40, %c0_41] : memref<1x64x32xbf16, #tpu.memory_space<vmem>>, vector<1x64x32xbf16>
    %115 = vector.shape_cast %114 : vector<1x64x32xbf16> to vector<64x32xbf16>
    %cst_42 = arith.constant dense<0.000000e+00> : vector<8x32xf32>
    %116 = tpu.matmul %113, %115, %cst_42 {dimension_numbers = #tpu.dot_dimension_numbers<[1], [0], [0], [1], [0, 0, 1, 1], [], []>} : vector<8x64xbf16>, vector<64x32xbf16>, vector<8x32xf32> -> vector<8x32xf32>
    %c0_43 = arith.constant 0 : index
    %c0_44 = arith.constant 0 : index
    %c0_45 = arith.constant 0 : index
    %117 = vector.load %arg12[%c0_43, %c0_44, %c0_45] : memref<1x1x32xf32, #tpu.memory_space<vmem>>, vector<1x1x32xf32>
    %118 = vector.shape_cast %117 : vector<1x1x32xf32> to vector<1x32xf32>
    %119 = vector.broadcast %118 : vector<1x32xf32> to vector<8x32xf32>
    %120 = arith.addf %116, %119 : vector<8x32xf32>
    %121 = arith.addf %102, %120 : vector<8x32xf32>
    %c0_46 = arith.constant 0 : index
    %c0_47 = arith.constant 0 : index
    %c0_48 = arith.constant 0 : index
    %122 = vector.load %arg13[%c0_46, %c0_47, %c0_48] : memref<1x1x32xf32, #tpu.memory_space<vmem>>, vector<1x1x32xf32>
    %123 = vector.shape_cast %122 : vector<1x1x32xf32> to vector<1x32xf32>
    %c0_49 = arith.constant 0 : index
    %c0_50 = arith.constant 0 : index
    %c0_51 = arith.constant 0 : index
    %124 = vector.load %arg14[%c0_49, %c0_50, %c0_51] : memref<1x1x32xf32, #tpu.memory_space<vmem>>, vector<1x1x32xf32>
    %125 = vector.shape_cast %124 : vector<1x1x32xf32> to vector<1x32xf32>
    %cst_52 = arith.constant dense<0.000000e+00> : vector<8xf32>
    %126 = vector.multi_reduction <add>, %121, %cst_52 [1] : vector<8x32xf32> to vector<8xf32>
    %127 = vector.shape_cast %126 : vector<8xf32> to vector<8x1xf32>
    %cst_53 = arith.constant 3.200000e+01 : f32
    %128 = vector.broadcast %cst_53 : f32 to vector<8x1xf32>
    %129 = arith.divf %127, %128 : vector<8x1xf32>
    %130 = vector.broadcast %129 : vector<8x1xf32> to vector<8x32xf32>
    %131 = arith.subf %121, %130 : vector<8x32xf32>
    %132 = arith.mulf %131, %131 : vector<8x32xf32>
    %cst_54 = arith.constant dense<0.000000e+00> : vector<8xf32>
    %133 = vector.multi_reduction <add>, %132, %cst_54 [1] : vector<8x32xf32> to vector<8xf32>
    %134 = vector.shape_cast %133 : vector<8xf32> to vector<8x1xf32>
    %cst_55 = arith.constant 3.200000e+01 : f32
    %135 = vector.broadcast %cst_55 : f32 to vector<8x1xf32>
    %136 = arith.divf %134, %135 : vector<8x1xf32>
    %137 = vector.broadcast %129 : vector<8x1xf32> to vector<8x32xf32>
    %138 = arith.subf %121, %137 : vector<8x32xf32>
    %cst_56 = arith.constant 9.99999974E-6 : f32
    %139 = vector.broadcast %cst_56 : f32 to vector<8x1xf32>
    %140 = arith.addf %136, %139 : vector<8x1xf32>
    %141 = math.rsqrt %140 : vector<8x1xf32>
    %142 = vector.broadcast %141 : vector<8x1xf32> to vector<8x32xf32>
    %143 = arith.mulf %138, %142 : vector<8x32xf32>
    %144 = vector.broadcast %123 : vector<1x32xf32> to vector<8x32xf32>
    %145 = arith.mulf %143, %144 : vector<8x32xf32>
    %146 = vector.broadcast %125 : vector<1x32xf32> to vector<8x32xf32>
    %147 = arith.addf %145, %146 : vector<8x32xf32>
    %c0_57 = arith.constant 0 : index
    %c0_58 = arith.constant 0 : index
    %148 = vector.load %arg16[%c0_57, %c0_58] : memref<8x32xf32, #tpu.memory_space<vmem>>, vector<8x32xf32>
    tpu.vector_store %arg16[%c0_57, %c0_58], %147 {strides = array<i32>} : memref<8x32xf32, #tpu.memory_space<vmem>>, vector<8x32xf32>,
    %c1_i32 = arith.constant 1 : i32
    %149 = arith.cmpi eq, %arg1, %c1_i32 : i32
    %150 = arith.extui %149 : i1 to i32
    %c0_i32_59 = arith.constant 0 : i32
    %151 = arith.cmpi ne, %150, %c0_i32_59 : i32
    scf.if %151 {
      %c0_60 = arith.constant 0 : index
      %c0_61 = arith.constant 0 : index
      %c0_62 = arith.constant 0 : index
      %152 = vector.load %arg15[%c0_60, %c0_61, %c0_62] : memref<1x8x32xf32, #tpu.memory_space<vmem>>, vector<1x8x32xf32>
      %153 = vector.shape_cast %152 : vector<1x8x32xf32> to vector<8x32xf32>
      %154 = vector.shape_cast %147 : vector<8x32xf32> to vector<1x8x32xf32>
      tpu.vector_store %arg15[%c0_60, %c0_61, %c0_62], %154 {strides = array<i32>} : memref<1x8x32xf32, #tpu.memory_space<vmem>>, vector<1x8x32xf32>,
    } else {
    }
    return
  }
  func.func @transform_0(%arg0: i32, %arg1: i32) -> (i32, i32, i32) {
    %c0_i32 = arith.constant 0 : i32
    %c0_i32_0 = arith.constant 0 : i32
    %c0_i32_1 = arith.constant 0 : i32
    return %arg0, %c0_i32, %c0_i32_0 : i32, i32, i32
  }
  func.func @transform_1(%arg0: i32, %arg1: i32) -> (i32, i32, i32) {
    %c0_i32 = arith.constant 0 : i32
    %c0_i32_0 = arith.constant 0 : i32
    %c0_i32_1 = arith.constant 0 : i32
    return %arg1, %c0_i32, %c0_i32_0 : i32, i32, i32
  }
  func.func @transform_2(%arg0: i32, %arg1: i32) -> (i32, i32, i32) {
    %c0_i32 = arith.constant 0 : i32
    %c0_i32_0 = arith.constant 0 : i32
    %c0_i32_1 = arith.constant 0 : i32
    return %arg1, %c0_i32, %c0_i32_0 : i32, i32, i32
  }
  func.func @transform_3(%arg0: i32, %arg1: i32) -> (i32, i32, i32) {
    %c0_i32 = arith.constant 0 : i32
    %c0_i32_0 = arith.constant 0 : i32
    %c0_i32_1 = arith.constant 0 : i32
    return %arg1, %c0_i32, %c0_i32_0 : i32, i32, i32
  }
  func.func @transform_4(%arg0: i32, %arg1: i32) -> (i32, i32, i32) {
    %c0_i32 = arith.constant 0 : i32
    %c0_i32_0 = arith.constant 0 : i32
    %c0_i32_1 = arith.constant 0 : i32
    return %arg1, %c0_i32, %c0_i32_0 : i32, i32, i32
  }
  func.func @transform_5(%arg0: i32, %arg1: i32) -> (i32, i32, i32) {
    %c0_i32 = arith.constant 0 : i32
    %c0_i32_0 = arith.constant 0 : i32
    %c0_i32_1 = arith.constant 0 : i32
    return %arg1, %c0_i32, %c0_i32_0 : i32, i32, i32
  }
  func.func @transform_6(%arg0: i32, %arg1: i32) -> (i32, i32, i32) {
    %c0_i32 = arith.constant 0 : i32
    %c0_i32_0 = arith.constant 0 : i32
    %c0_i32_1 = arith.constant 0 : i32
    return %arg1, %c0_i32, %c0_i32_0 : i32, i32, i32
  }
  func.func @transform_7(%arg0: i32, %arg1: i32) -> (i32, i32, i32) {
    %c0_i32 = arith.constant 0 : i32
    %c0_i32_0 = arith.constant 0 : i32
    %c0_i32_1 = arith.constant 0 : i32
    return %arg1, %c0_i32, %c0_i32_0 : i32, i32, i32
  }
  func.func @transform_8(%arg0: i32, %arg1: i32) -> (i32, i32, i32) {
    %c0_i32 = arith.constant 0 : i32
    %c0_i32_0 = arith.constant 0 : i32
    %c0_i32_1 = arith.constant 0 : i32
    return %arg1, %c0_i32, %c0_i32_0 : i32, i32, i32
  }
  func.func @transform_9(%arg0: i32, %arg1: i32) -> (i32, i32, i32) {
    %c0_i32 = arith.constant 0 : i32
    %c0_i32_0 = arith.constant 0 : i32
    %c0_i32_1 = arith.constant 0 : i32
    return %arg1, %c0_i32, %c0_i32_0 : i32, i32, i32
  }
  func.func @transform_10(%arg0: i32, %arg1: i32) -> (i32, i32, i32) {
    %c0_i32 = arith.constant 0 : i32
    %c0_i32_0 = arith.constant 0 : i32
    %c0_i32_1 = arith.constant 0 : i32
    return %arg1, %c0_i32, %c0_i32_0 : i32, i32, i32
  }
  func.func @transform_11(%arg0: i32, %arg1: i32) -> (i32, i32, i32) {
    %c0_i32 = arith.constant 0 : i32
    %c0_i32_0 = arith.constant 0 : i32
    %c0_i32_1 = arith.constant 0 : i32
    return %arg1, %c0_i32, %c0_i32_0 : i32, i32, i32
  }
  func.func @transform_12(%arg0: i32, %arg1: i32) -> (i32, i32, i32) {
    %c0_i32 = arith.constant 0 : i32
    %c0_i32_0 = arith.constant 0 : i32
    %c0_i32_1 = arith.constant 0 : i32
    return %arg1, %c0_i32, %c0_i32_0 : i32, i32, i32
  }
  func.func @transform_13(%arg0: i32, %arg1: i32) -> (i32, i32, i32) {
    %c0_i32 = arith.constant 0 : i32
    %c0_i32_0 = arith.constant 0 : i32
    %c0_i32_1 = arith.constant 0 : i32
    return %arg0, %c0_i32, %c0_i32_0 : i32, i32, i32
  }
}

</mosaic_0001>

<bundles_post_ra>
// kernel: mask_lm_forward.3
= control target key start
LH: loop header
LB: loop body
LE: loop exit
PB: predicated region body
PF: predicated region fallthrough
CT: control target
= control target key end

     0   :  { %12 = vsyncpa [#allocation4], 0  ;;  %s702_s0 = inlined_call_operand.hbm [shape: f32[6,32], index: 0, kind: input, shape index: {}]   ;;  %s703_s1 = inlined_call_operand.hbm [shape: bf16[32,32], index: 1, kind: input, shape index: {}]   ;;  %s704_s2 = inlined_call_operand.hbm [shape: f32[1,32], index: 2, kind: input, shape index: {}]   ;;  %s705_s3 = inlined_call_operand.hbm [shape: f32[1,32], index: 3, kind: input, shape index: {}]   ;;  %s706_s4 = inlined_call_operand.hbm [shape: f32[1,32], index: 4, kind: input, shape index: {}]   ;;  %s707_s5 = inlined_call_operand.hbm [shape: bf16[32,128], index: 5, kind: input, shape index: {}]   ;;  %s708_s6 = inlined_call_operand.hbm [shape: f32[1,128], index: 6, kind: input, shape index: {}]   ;;  %s709_s7 = inlined_call_operand.hbm [shape: f32[6,128], index: 7, kind: output, shape index: {}]  }
   0x1   :  { %13 = vsyncpa [#allocation7], 0 }
   0x2   :  { %14 = vsyncpa [#allocation10], 0 }
   0x3   :  { %15 = vsyncpa [#allocation13], 0 }
   0x4   :  { %16 = vsyncpa [#allocation5], 0  ;;  %s543_s24 = smov [#allocation6]   ;;  %s357_s28 = scalar_lea.hbm %s703_s1, 256 }
   0x5   :  { %s32_s25 = sshll.u32 %s543_s24, 4  ;;  %p358_p0 = scmp.ne.s32.totalorder %s703_s1, %s357_s28  ;;  %s33_s25 = int_to_ptr.vmem [resolvable:$true] %s32_s25 }
   0x6   :  { %p361_p1 = scmp.lt.u32.totalorder %s357_s28, %s703_s1 }
   0x8   :  { %p363_p2 = pnand %p361_p1, %p358_p0 }
   0xa   :  { %366 = shalt.err (!%p363_p2)
}
   0xb   :  { %s367_s10 = scalar_lea.vmem %s33_s25, 256  ;;  %p372_p4 = scmp.lt.s32.totalorder %s33_s25, %s33_s25 }
   0xc   :  { %p368_p3 = scmp.ne.s32.totalorder %s33_s25, %s367_s10  ;;  %p373_p5 = scmp.lt.s32.totalorder %s367_s10, %s367_s10 }
   0xe   :  { %p374_p6 = por %p373_p5, %p372_p4 }
  0x10   :  { %p375_p7 = pnand %p374_p6, %p368_p3 }
  0x12   :  { %378 = shalt.err (!%p375_p7)
}
  0x13   :  { %s544_s11 = smov 64   ;;  %s545_s12 = smov 4  }
  0x14   :  { %38 = dma.hbm_to_vmem [thread:$0]  %s703_s1, 256, %s33_s25, [#allocation7], %s544_s11, %s544_s11, %s545_s12  }
  0x15   :  { %s546_s15 = smov [#allocation9]   ;;  %s547_s17 = smov [#allocation12]  }
  0x16   :  { %s55_s16 = sshll.u32 %s546_s15, 4  ;;  %s74_s18 = sshll.u32 %s547_s17, 4  ;;  %s56_s16 = int_to_ptr.vmem [resolvable:$true] %s55_s16  ;;  %s75_s18 = int_to_ptr.vmem [resolvable:$true] %s74_s18 }
  0x17   :  { %s379_s21 = scalar_lea.hbm %s705_s3, 16 }
  0x18   :  { %p380_p8 = scmp.ne.s32.totalorder %s705_s3, %s379_s21  ;;  %p383_p9 = scmp.lt.u32.totalorder %s379_s21, %s705_s3 }
  0x1a   :  { %p385_p10 = pnand %p383_p9, %p380_p8 }
  0x1c   :  { %388 = shalt.err (!%p385_p10)
}
  0x1d   :  { %s389_s1 = scalar_lea.vmem %s56_s16, 16  ;;  %s393_s25 = scalar_lea.vmem %s56_s16, 32 }
  0x1e   :  { %p390_p11 = scmp.ne.s32.totalorder %s56_s16, %s389_s1  ;;  %p394_p12 = scmp.lt.s32.totalorder %s56_s16, %s56_s16 }
  0x1f   :  { %p395_p13 = scmp.lt.s32.totalorder %s393_s25, %s389_s1 }
  0x21   :  { %p396_p0 = por %p395_p13, %p394_p12 }
  0x23   :  { %p397_p1 = pnand %p396_p0, %p390_p11 }
  0x25   :  { %400 = shalt.err (!%p397_p1)
}
  0x26   :  { %58 = dma.hbm_to_vmem [thread:$0]  %s705_s3, 16, %s56_s16, [#allocation10]  }
  0x27   :  { %s401_s8 = scalar_lea.hbm %s707_s5, 256 }
  0x28   :  { %p402_p2 = scmp.ne.s32.totalorder %s707_s5, %s401_s8  ;;  %p405_p3 = scmp.lt.u32.totalorder %s401_s8, %s707_s5 }
  0x2a   :  { %p407_p4 = pnand %p405_p3, %p402_p2 }
  0x2c   :  { %410 = shalt.err (!%p407_p4)
}
  0x2d   :  { %s411_s15 = scalar_lea.vmem %s75_s18, 256  ;;  %p416_p6 = scmp.lt.s32.totalorder %s75_s18, %s75_s18 }
  0x2e   :  { %p412_p5 = scmp.ne.s32.totalorder %s75_s18, %s411_s15  ;;  %p417_p7 = scmp.lt.s32.totalorder %s411_s15, %s411_s15 }
  0x30   :  { %p418_p8 = por %p417_p7, %p416_p6 }
  0x32   :  { %p419_p9 = pnand %p418_p8, %p412_p5 }
  0x34   :  { %422 = shalt.err (!%p419_p9)
}
  0x35   :  { %80 = dma.hbm_to_vmem [thread:$0]  %s707_s5, 256, %s75_s18, [#allocation13], %s544_s11, %s544_s11, %s545_s12  }
  0x36   :  { %s548_s17 = smov [#allocation3]   ;;  %s549_s20 = smov [#allocation8]  }
  0x37   :  { %s23_s19 = sshll.u32 %s548_s17, 4  ;;  %s45_s21 = sshll.u32 %s549_s20, 4  ;;  %s24_s19 = int_to_ptr.vmem [resolvable:$true] %s23_s19  ;;  %s46_s21 = int_to_ptr.vmem [resolvable:$true] %s45_s21 }
  0x38   :  { %s423_s24 = scalar_lea.hbm %s702_s0, 128 }
  0x39   :  { %p424_p10 = scmp.ne.s32.totalorder %s702_s0, %s423_s24  ;;  %p427_p11 = scmp.lt.u32.totalorder %s423_s24, %s702_s0 }
  0x3b   :  { %p429_p12 = pnand %p427_p11, %p424_p10 }
  0x3d   :  { %432 = shalt.err (!%p429_p12)
}
  0x3e   :  { %s433_s5 = scalar_lea.vmem %s24_s19, 128  ;;  %p438_p0 = scmp.lt.s32.totalorder %s24_s19, %s24_s19 }
  0x3f   :  { %p434_p13 = scmp.ne.s32.totalorder %s24_s19, %s433_s5  ;;  %p439_p1 = scmp.lt.s32.totalorder %s433_s5, %s433_s5 }
  0x41   :  { %p440_p2 = por %p439_p1, %p438_p0 }
  0x43   :  { %p441_p3 = pnand %p440_p2, %p434_p13 }
  0x45   :  { %444 = shalt.err (!%p441_p3)
}
  0x46   :  { %26 = dma.hbm_to_vmem [thread:$0]  %s702_s0, 128, %s24_s19, [#allocation4]  }
  0x47   :  { %s445_s29 = scalar_lea.hbm %s704_s2, 16 }
  0x48   :  { %p446_p4 = scmp.ne.s32.totalorder %s704_s2, %s445_s29  ;;  %p449_p5 = scmp.lt.u32.totalorder %s445_s29, %s704_s2 }
  0x4a   :  { %p451_p6 = pnand %p449_p5, %p446_p4 }
  0x4c   :  { %454 = shalt.err (!%p451_p6)
}
  0x4d   :  { %s455_s13 = scalar_lea.vmem %s46_s21, 16  ;;  %s459_s14 = scalar_lea.vmem %s46_s21, 32 }
  0x4e   :  { %p456_p7 = scmp.ne.s32.totalorder %s46_s21, %s455_s13  ;;  %p460_p8 = scmp.lt.s32.totalorder %s46_s21, %s46_s21 }
  0x4f   :  { %p461_p9 = scmp.lt.s32.totalorder %s459_s14, %s455_s13 }
  0x51   :  { %p462_p10 = por %p461_p9, %p460_p8 }
  0x53   :  { %p463_p11 = pnand %p462_p10, %p456_p7 }
  0x55   :  { %466 = shalt.err (!%p463_p11)
}
  0x56   :  { %48 = dma.hbm_to_vmem [thread:$0]  %s704_s2, 16, %s46_s21, [#allocation7]  }
  0x57   :  { %s550_s3 = smov [#allocation11]   ;;  %s551_s17 = smov [#allocation14]  }
  0x58   :  { %s65_s16 = sshll.u32 %s550_s3, 4  ;;  %s87_s19 = sshll.u32 %s551_s17, 4  ;;  %s66_s16 = int_to_ptr.vmem [resolvable:$true] %s65_s16  ;;  %s88_s19 = int_to_ptr.vmem [resolvable:$true] %s87_s19 }
  0x59   :  { %s467_s23 = scalar_lea.hbm %s706_s4, 16 }
  0x5a   :  { %p468_p12 = scmp.ne.s32.totalorder %s706_s4, %s467_s23  ;;  %p471_p13 = scmp.lt.u32.totalorder %s467_s23, %s706_s4 }
  0x5c   :  { %p473_p0 = pnand %p471_p13, %p468_p12 }
  0x5e   :  { %476 = shalt.err (!%p473_p0)
}
  0x5f   :  { %s477_s2 = scalar_lea.vmem %s66_s16, 16  ;;  %s481_s21 = scalar_lea.vmem %s66_s16, 32 }
  0x60   :  { %p478_p1 = scmp.ne.s32.totalorder %s66_s16, %s477_s2  ;;  %p482_p2 = scmp.lt.s32.totalorder %s66_s16, %s66_s16 }
  0x61   :  { %p483_p3 = scmp.lt.s32.totalorder %s481_s21, %s477_s2 }
  0x63   :  { %p484_p4 = por %p483_p3, %p482_p2 }
  0x65   :  { %p485_p5 = pnand %p484_p4, %p478_p1 }
  0x67   :  { %488 = shalt.err (!%p485_p5)
}
  0x68   :  { %68 = dma.hbm_to_vmem [thread:$0]  %s706_s4, 16, %s66_s16, [#allocation10]  }
  0x69   :  { %s489_s18 = scalar_lea.hbm %s708_s6, 16 }
  0x6a   :  { %p490_p6 = scmp.ne.s32.totalorder %s708_s6, %s489_s18  ;;  %p493_p7 = scmp.lt.u32.totalorder %s489_s18, %s708_s6 }
  0x6c   :  { %p495_p8 = pnand %p493_p7, %p490_p6 }
  0x6e   :  { %498 = shalt.err (!%p495_p8)
}
  0x6f   :  { %s499_s9 = scalar_lea.vmem %s88_s19, 16  ;;  %s503_s10 = scalar_lea.vmem %s88_s19, 32 }
  0x70   :  { %p500_p9 = scmp.ne.s32.totalorder %s88_s19, %s499_s9  ;;  %p504_p10 = scmp.lt.s32.totalorder %s88_s19, %s88_s19 }
  0x71   :  { %p505_p11 = scmp.lt.s32.totalorder %s503_s10, %s499_s9 }
  0x73   :  { %p506_p12 = por %p505_p11, %p504_p10 }
  0x75   :  { %p507_p13 = pnand %p506_p12, %p500_p9 }
  0x77   :  { %510 = shalt.err (!%p507_p13)
}
  0x78   :  { %90 = dma.hbm_to_vmem [thread:$0]  %s708_s6, 16, %s88_s19, [#allocation13]  }
  0x79   :  { %533 = dma.done.wait [#allocation4], 128  }
  0x7a   :  { %534 = vsyncadd [#allocation4], 4294967168 }
  0x7b   :  { %535 = dma.done.wait [#allocation7], 272  }
  0x7c   :  { %536 = vsyncadd [#allocation7], 4294967024 }
  0x7d   :  { %537 = dma.done.wait [#allocation10], 32  }
  0x7e   :  { %538 = vsyncadd [#allocation10], 4294967264 }
  0x7f   :  { %539 = dma.done.wait [#allocation13], 272  }
  0x80   :  { %540 = vsyncadd [#allocation13], 4294967024  ;;  %v552_v0 = vmov 0.0   ;;  %vm553_vm0 = vmmov 0   ;;  %v351_v1 = vld [vmem:[#allocation6] sm:$0xff]   ;;  %v352_v2 = vld [vmem:[#allocation6 + $0x8] sm:$0xff]  }
  0x81   :  { %323 = vmatprep.subr.bf16.mxu0 %v552_v0  ;;  %327 = vmatprep.mubr.msk.bf16.mxu0 %vm553_vm0, %v552_v0  ;;  %v117_v3 = vld [vmem:[#allocation3] sm:$0x3f]  ;;  %vm142_vm1 = vcmask 261120   ;;  %v307_v5 = vld [vmem:[#allocation8] ss:$0 sm:$0xff]  ;;  %vm189_vm2 = vcmask 259072  }
  0x82   :  { %331 = vmatprep.subr.bf16.mxu1 %v552_v0  ;;  %335 = vmatprep.mubr.msk.bf16.mxu1 %vm553_vm0, %v552_v0  ;;  %v118_v4 = vpack.c.bf16 %v117_v3, %v117_v3  ;;  %v353_v18 = vld [vmem:[#allocation12] sm:$0xff]   ;;  %v354_v19 = vld [vmem:[#allocation12 + $0x8] sm:$0xff]   ;;  %v311_v24 = vld [vmem:[#allocation9] ss:$0 sm:$0xff]  ;;  %s554_s6 = smov [#allocation15]  }
  0x83   :  { %324 = vmatpush3.bf16.msra.mxu0 %v351_v1  ;;  %332 = vmatpush3.bf16.msra.mxu1 %v353_v18  ;;  %v312_v26 = vld [vmem:[#allocation11] ss:$0 sm:$0xff]  ;;  %v313_v31 = vld [vmem:[#allocation14] ss:$0 sm:$0xff]  ;;  %s295_s14 = sshll.u32 %s554_s6, 4  ;;  %s296_s14 = int_to_ptr.vmem [resolvable:$true] %s295_s14 }
  0x84   :  { %325 = vmatprep.subr.bf16.mxu0 %v552_v0  ;;  %333 = vmatprep.subr.bf16.mxu1 %v552_v0  ;;  %s511_s0 = scalar_lea.vmem %s296_s14, 128  ;;  %p516_p1 = scmp.lt.s32.totalorder %s296_s14, %s296_s14 }
  0x85   :  { %p512_p0 = scmp.ne.s32.totalorder %s296_s14, %s511_s0  ;;  %p517_p2 = scmp.lt.s32.totalorder %s511_s0, %s511_s0 }
  0x87   :  { %326 = vmatpush3.bf16.msra.mxu0 %v352_v2  ;;  %334 = vmatpush3.bf16.msra.mxu1 %v354_v19  ;;  %p518_p3 = por %p517_p2, %p516_p1 }
  0x89   :  { %p519_p4 = pnand %p518_p3, %p512_p0 }
  0x8a   :  { %328 = vmatmul.mubr.msk.bf16.vlgmr.msra.gmra.mrb[0].mxu0 %vm142_vm1, %v118_v4 }
 0x15d   :  { %v180_v6 = vpop.f32.mrb[0].mxu0 }
 0x15e   :  { %v181_v7 = vadd.f32 %v307_v5, %v180_v6  ;;  %v329_v8 = vpop.f32.mrb[1].mxu0 }
 0x15f   :  { %v183_v9 = vpop.f32.mrb[2].mxu0 }
 0x160   :  { %v186_v10 = vmax.f32 %v181_v7, 0.0  ;;  %v330_v11 = vpop.f32.mrb[3].mxu0 }
 0x162   :  { %v190_v12 = vsel %vm189_vm2, %v186_v10, 0.0 }
 0x163   :  { %191 = vadd.xlane.f32.xlu0 %v190_v12 }
 0x1f0   :  { %v192_v13 = vpop.xlane.xlu0 %191 }
 0x1f1   :  { %v194_v14 = vmul.f32 0.03125, %v192_v13 }
 0x1f3   :  { %v195_v15 = vsub.f32 %v186_v10, %v194_v14 }
 0x1f5   :  { %v196_v16 = vmul.f32 %v195_v15, %v195_v15 }
 0x1f7   :  { %v197_v17 = vsel %vm189_vm2, %v196_v16, 0.0 }
 0x1f8   :  { %198 = vadd.xlane.f32.xlu0 %v197_v17 }
 0x285   :  { %v199_v20 = vpop.xlane.xlu0 %198 }
 0x286   :  { %v200_v21 = vmul.f32 0.03125, %v199_v20 }
 0x288   :  { %v201_v22 = vadd.f32 1e-05, %v200_v21 }
 0x28a   :  { %355 = vrsqrt.f32 %v201_v22 }
 0x294   :  { %v356_v23 = vpop.eup %355 }
 0x295   :  { %v203_v25 = vmul.f32 %v356_v23, %v195_v15 }
 0x297   :  { %v210_v27 = vmul.f32 %v311_v24, %v203_v25 }
 0x299   :  { %v217_v28 = vadd.f32 %v312_v26, %v210_v27 }
 0x29b   :  { %218 = vst.msk [vmem:[#allocation2] sm:$0x3f] %vm189_vm2, %v217_v28 }
 0x2a2   :  { %v219_v29 = vld [vmem:[#allocation2] sm:$0x3f] }
 0x2a3   :  { %v220_v30 = vpack.c.bf16 %v219_v29, %v219_v29 }
 0x2a5   :  { %336 = vmatmul.mubr.msk.bf16.vlgmr.msra.gmra.mrb[0].mxu1 %vm142_vm1, %v220_v30 }
 0x378   :  { %v282_v32 = vpop.f32.mrb[0].mxu1 }
 0x379   :  { %v283_v33 = vadd.f32 %v313_v31, %v282_v32  ;;  %v337_v34 = vpop.f32.mrb[1].mxu1 }
 0x37a   :  { %v285_v35 = vpop.f32.mrb[2].mxu1 }
 0x37b   :  { %288 = vst [vmem:[#allocation15] sm:$0x3f] %v283_v33  ;;  %v338_v36 = vpop.f32.mrb[3].mxu1 }
 0x37c   :  { %522 = shalt.err (!%p519_p4)
}
 0x37d   :  { %s523_s16 = scalar_lea.hbm %s709_s7, 128 }
 0x37e   :  { %p524_p5 = scmp.ne.s32.totalorder %s709_s7, %s523_s16  ;;  %p527_p6 = scmp.lt.u32.totalorder %s523_s16, %s709_s7 }
 0x380   :  { %p529_p7 = pnand %p527_p6, %p524_p5 }
 0x382   :  { %532 = shalt.err (!%p529_p7)
}
 0x383   :  { %298 = dma.vmem_to_hbm [thread:$0]  %s296_s14, 128, %s709_s7, [#allocation5]  }
 0x384   :  { %541 = dma.done.wait [#allocation5], 128  }
 0x385   :  { %542 = vsyncadd [#allocation5], 4294967168 }
 0x386   :  { %302 = vsyncpa [#allocation4], 1 }
 0x387   :  { %303 = vsyncpa [#allocation7], 1 }
 0x388   :  { %304 = vsyncpa [#allocation10], 1 }
 0x389   :  { %305 = vsyncpa [#allocation13], 1 }
 0x38a   :  { %306 = vsyncpa [#allocation5], 1 }

// kernel: mask_lm_forward.2
= control target key start
LH: loop header
LB: loop body
LE: loop exit
PB: predicated region body
PF: predicated region fallthrough
CT: control target
= control target key end

     0   :  { %s3900_s0 = inlined_call_operand.hbm [shape: bf16[2,8,32], index: 0, kind: input, shape index: {}]   ;;  %s3901_s1 = inlined_call_operand.hbm [shape: bf16[2,32,96], index: 1, kind: input, shape index: {}]   ;;  %s3902_s2 = inlined_call_operand.hbm [shape: f32[2,1,96], index: 2, kind: input, shape index: {}]   ;;  %s3903_s3 = inlined_call_operand.hbm [shape: bf16[2,32,32], index: 3, kind: input, shape index: {}]   ;;  %s3904_s4 = inlined_call_operand.hbm [shape: f32[2,1,32], index: 4, kind: input, shape index: {}]   ;;  %s3905_s5 = inlined_call_operand.hbm [shape: f32[2,1,32], index: 5, kind: input, shape index: {}]   ;;  %s3906_s6 = inlined_call_operand.hbm [shape: f32[2,1,32], index: 6, kind: input, shape index: {}]   ;;  %s3907_s7 = inlined_call_operand.hbm [shape: bf16[2,32,64], index: 7, kind: input, shape index: {}]   ;;  %s3908_s8 = inlined_call_operand.hbm [shape: f32[2,1,64], index: 8, kind: input, shape index: {}]   ;;  %s3909_s9 = inlined_call_operand.hbm [shape: bf16[2,64,32], index: 9, kind: input, shape index: {}]   ;;  %s3910_s10 = inlined_call_operand.hbm [shape: f32[2,1,32], index: 10, kind: input, shape index: {}]   ;;  %s3911_s11 = inlined_call_operand.hbm [shape: f32[2,1,32], index: 11, kind: input, shape index: {}]   ;;  %s3912_s12 = inlined_call_operand.hbm [shape: f32[2,1,32], index: 12, kind: input, shape index: {}]   ;;  %s3913_s13 = inlined_call_operand.hbm [shape: f32[2,8,32], index: 13, kind: output, shape index: {}]  }
   0x1   :  { %3950 = sst [smem:[#allocation46_spill]] %s3900_s0 }
   0x2   :  { %3951 = sst [smem:[#allocation47_spill]] %s3901_s1 }
   0x3   :  { %3952 = sst [smem:[#allocation48_spill]] %s3902_s2 }
   0x4   :  { %3953 = sst [smem:[#allocation49_spill]] %s3903_s3 }
   0x5   :  { %3954 = sst [smem:[#allocation50_spill]] %s3904_s4 }
   0x6   :  { %3955 = sst [smem:[#allocation51_spill]] %s3905_s5 }
   0x7   :  { %3956 = sst [smem:[#allocation52_spill]] %s3906_s6 }
   0x8   :  { %3957 = sst [smem:[#allocation53_spill]] %s3907_s7 }
   0x9   :  { %3958 = sst [smem:[#allocation54_spill]] %s3908_s8 }
   0xa   :  { %3959 = sst [smem:[#allocation55_spill]] %s3909_s9 }
   0xb   :  { %3960 = sst [smem:[#allocation56_spill]] %s3910_s10 }
   0xc   :  { %3961 = sst [smem:[#allocation57_spill]] %s3911_s11 }
   0xd   :  { %3962 = sst [smem:[#allocation58_spill]] %s3912_s12 }
   0xe   :  { %3963 = sst [smem:[#allocation59_spill]] %s3913_s13 }
   0xf   :  { %18 = vsyncpa [#allocation4], 0 }
  0x10   :  { %20 = vsyncpa [#allocation4 + $0x1], 0 }
  0x11   :  { %21 = vsyncpa [#allocation7], 0 }
  0x12   :  { %23 = vsyncpa [#allocation7 + $0x1], 0 }
  0x13   :  { %24 = vsyncpa [#allocation10], 0 }
  0x14   :  { %26 = vsyncpa [#allocation10 + $0x1], 0 }
  0x15   :  { %27 = vsyncpa [#allocation13], 0 }
  0x16   :  { %29 = vsyncpa [#allocation13 + $0x1], 0 }
  0x17   :  { %30 = vsyncpa [#allocation16], 0 }
  0x18   :  { %32 = vsyncpa [#allocation16 + $0x1], 0 }
  0x19   :  { %33 = vsyncpa [#allocation19], 0 }
  0x1a   :  { %35 = vsyncpa [#allocation19 + $0x1], 0 }
  0x1b   :  { %36 = vsyncpa [#allocation22], 0 }
  0x1c   :  { %38 = vsyncpa [#allocation22 + $0x1], 0 }
  0x1d   :  { %39 = vsyncpa [#allocation5], 0 }
  0x1e   :  { %41 = vsyncpa [#allocation5 + $0x1], 0  ;;  %s3068_s25 = smov 0   ;;  %s3070_s26 = smov 0  }
  0x1f   :  { %s3072_s27 = smov 0   ;;  %s3074_s28 = smov 0  }
  0x20   :  { %s3076_s29 = smov 0   ;;  %s3078_s30 = smov 0  }
  0x21   :  { %s3080_s14 = smov 0   ;;  %s3082_s15 = smov 0  }
  0x22   :  { %s3084_s16 = smov 0   ;;  %s3086_s17 = smov 0  }
  0x23   :  { %s3088_s18 = smov 0  }
  0x24 LB: > { %3964 = sst [smem:[#allocation33_spill]] %s2930_s25  ;;  %p3922_p0 = scmp.eq.s32.totalorder %s2970_s18, 0  ;;  %s2970_s18 = sphi %s3088_s18, %s47_s18   ;;  %s2966_s17 = sphi %s3086_s17, %s4042_s17   ;;  %s2962_s16 = sphi %s3084_s16, %s4041_s16   ;;  %s2958_s15 = sphi %s3082_s15, %s4040_s15   ;;  %s2954_s14 = sphi %s3080_s14, %s4039_s14   ;;  %s2950_s30 = sphi %s3078_s30, %s4038_s30   ;;  %s2946_s29 = sphi %s3076_s29, %s4044_s29   ;;  %s2942_s28 = sphi %s3074_s28, %s4043_s28   ;;  %s2938_s27 = sphi %s3072_s27, %s4036_s27   ;;  %s2934_s26 = sphi %s3070_s26, %s4035_s26   ;;  %s2930_s25 = sphi %s3068_s25, %s4034_s25  }
  0x25   : > { %3965 = sst [smem:[#allocation34_spill]] %s2934_s26  ;;  %p99_p1 = scmp.ne.s32.totalorder %s2938_s27, %s2934_s26 }
  0x26   : > { %3966 = sst [smem:[#allocation35_spill]] %s2938_s27  ;;  %p3921_p2 = scmp.lt.s32.totalorder %s2970_s18, 4 }
  0x27   : > { %3967 = sst [smem:[#allocation36_spill]] %s2950_s30  ;;  %p101_p3 = por %p99_p1, %p3922_p0 }
  0x28   : > { %3968 = sst [smem:[#allocation37_spill]] %s2954_s14  ;;  %s3130_s19 = sand.u32 1, %s2970_s18  }
  0x29   : > { %3969 = sst [smem:[#allocation38_spill]] %s2958_s15  ;;  %s3133_s20 = sand.u32 1, %s2938_s27  }
  0x2a   : > { %3970 = sst [smem:[#allocation39_spill]] %s2962_s16  ;;  %s3136_s21 = sshll.u32 %s3133_s20, 4 }
  0x2b   : > { %3971 = sst [smem:[#allocation40_spill]] %s2966_s17  ;;  %s3139_s22 = sshll.u32 %s2962_s16, 8 }
  0x2c   : > { %s3972_s1 = sld [smem:[#allocation47_spill]]  ;;  %s463_s15 = scalar_lea.vmem [#allocation6], %s3136_s21 }
  0x2d   : > { %s470_s14 = sshll.u32 %s463_s15, 4  ;;  %p3150_p4 = pnand %p3921_p2, %p101_p3  ;;  %s3154_s14 = int_to_ptr.vmem [resolvable:$true] %s470_s14 }
  0x2f   : > { %s3973_s12 = scalar_select %p3150_p4, 1, 0 }
  0x30   : > { %p3161_p6 = pneg %p3150_p4 }
  0x32   : > { %s3145_s13 = scalar_lea.hbm %s3972_s1, %s3139_s22  ;;  %s2439_s6 = scalar_lea.hbm %s3972_s1, 512 }
  0x33   : > { %s2434_s8 = scalar_lea.hbm %s3145_s13, 256  ;;  %p2440_p9 = scmp.lt.u32.totalorder %s3145_s13, %s3972_s1 }
  0x34   : > { %p2435_p5 = scmp.ne.s32.totalorder %s3145_s13, %s2434_s8  ;;  %p2441_p10 = scmp.lt.u32.totalorder %s2439_s6, %s2434_s8 }
  0x35   : > { %p2443_p12 = scmp.lt.u32.totalorder %s2434_s8, %s3145_s13 }
  0x36   : > { %p2437_p7 = pnand %p3161_p6, %p2435_p5  ;;  %p2442_p11 = por %p2441_p10, %p2440_p9 }
  0x38   : > { %p2438_p8 = pneg %p2437_p7  ;;  %p2444_p13 = por %p2443_p12, %p2442_p11 }
  0x3a   : > { %p2445_p1 = pnand %p2444_p13, %p2438_p8 }
  0x3c   : > { %2448 = shalt.err (!%p2445_p1)
}
  0x3d   : > { %s2449_s10 = scalar_lea.vmem %s3154_s14, 256  ;;  %s2972_s15 = smov [#allocation6]  }
  0x3e   : > { %p2450_p3 = scmp.ne.s32.totalorder %s3154_s14, %s2449_s10  ;;  %s2454_s24 = sshll.u32 %s2972_s15, 4  ;;  %s2455_s24 = int_to_ptr.vmem [resolvable:$false] %s2454_s24 }
  0x3f   : > { %s2456_s2 = scalar_lea.vmem %s2455_s24, 512  ;;  %p2457_p2 = scmp.lt.s32.totalorder %s3154_s14, %s2455_s24 }
  0x40   : > { %p2452_p5 = pnand %p2450_p3, %p3161_p6  ;;  %p2458_p0 = scmp.lt.s32.totalorder %s2456_s2, %s2449_s10 }
  0x42   : > { %p2453_p7 = pneg %p2452_p5  ;;  %p2459_p9 = por %p2458_p0, %p2457_p2 }
  0x44   : > { %p2460_p10 = pnand %p2459_p9, %p2453_p7 }
  0x46   : > { %2463 = shalt.err (!%p2460_p10)
}
  0x47   : > { %s3925_s4 = smov 64   ;;  %s3927_s6 = smov 4  }
  0x48   : > { %s3975_s8 = scalar_lea.sflag [#allocation7], %s3130_s19  ;;  %p2069_p0 = scmp.ge.s32.totalorder %s2970_s18, 1 }
  0x49   : > { %2264 = dma.hbm_to_vmem [thread:$0]  (!%p3150_p4), %s3145_s13, 256, %s3154_s14, %s3975_s8, %s3925_s4, %s3925_s4, %s3927_s6  }
  0x4a   : > { %p677_p2 = scmp.lt.s32.totalorder %s2970_s18, 5  ;;  %s3978_s3 = sld [smem:[#allocation49_spill]] }
  0x4b   : > { %s501_s1 = scalar_lea.vmem [#allocation9], %s3136_s21  ;;  %s3203_s26 = sshll.u32 %s2962_s16, 4 }
  0x4c   : > { %p3191_p8 = pnand %p2069_p0, %p677_p2  ;;  %s508_s0 = sshll.u32 %s501_s1, 4  ;;  %s3205_s0 = int_to_ptr.vmem [resolvable:$true] %s508_s0 }
  0x4d   : > { %s3930_s13 = scalar_lea.sflag [#allocation10], %s3130_s19 }
  0x4e   : > { %s3976_s10 = scalar_select %p3191_p8, 1, 0 }
  0x50   : > { %3977 = sst [smem:[#allocation41_spill]] %s3976_s10  ;;  %s3199_s2 = scalar_lea.hbm %s3978_s3, %s3139_s22 }
  0x51   : > { %s2464_s14 = scalar_lea.hbm %s3199_s2, 256  ;;  %s2469_s24 = scalar_lea.hbm %s3978_s3, 512 }
  0x52   : > { %p2465_p11 = scmp.ne.s32.totalorder %s3199_s2, %s2464_s14  ;;  %p2470_p1 = scmp.lt.u32.totalorder %s3199_s2, %s3978_s3 }
  0x53   : > { %p2471_p3 = scmp.lt.u32.totalorder %s2469_s24, %s2464_s14  ;;  %p2473_p7 = scmp.lt.u32.totalorder %s2464_s14, %s3199_s2 }
  0x54   : > { %p2467_p12 = pnand %p2465_p11, %p3161_p6 }
  0x55   : > { %p2472_p5 = por %p2471_p3, %p2470_p1 }
  0x56   : > { %p2468_p13 = pneg %p2467_p12 }
  0x57   : > { %p2474_p9 = por %p2473_p7, %p2472_p5 }
  0x59   : > { %p2475_p10 = pnand %p2474_p9, %p2468_p13 }
  0x5b   : > { %2478 = shalt.err (!%p2475_p10)
}
  0x5c   : > { %s2479_s1 = scalar_lea.vmem %s3205_s0, 256  ;;  %s2975_s8 = smov [#allocation9]  }
  0x5d   : > { %p2480_p0 = scmp.ne.s32.totalorder %s3205_s0, %s2479_s1  ;;  %s2484_s15 = sshll.u32 %s2975_s8, 4  ;;  %s2485_s15 = int_to_ptr.vmem [resolvable:$false] %s2484_s15 }
  0x5e   : > { %s2486_s4 = scalar_lea.vmem %s2485_s15, 512  ;;  %p2487_p12 = scmp.lt.s32.totalorder %s3205_s0, %s2485_s15 }
  0x5f   : > { %p2482_p2 = pnand %p2480_p0, %p3161_p6  ;;  %p2488_p8 = scmp.lt.s32.totalorder %s2486_s4, %s2479_s1 }
  0x61   : > { %p2483_p11 = pneg %p2482_p2  ;;  %p2489_p1 = por %p2488_p8, %p2487_p12 }
  0x63   : > { %p2490_p3 = pnand %p2489_p1, %p2483_p11 }
  0x65   : > { %2493 = shalt.err (!%p2490_p3)
}
  0x66   : > { %s3979_s6 = smov 4   ;;  %s3980_s14 = smov 64  }
  0x67   : > { %2270 = dma.hbm_to_vmem [thread:$0]  (!%p3150_p4), %s3199_s2, 256, %s3205_s0, %s3930_s13, %s3980_s14, %s3980_s14, %s3979_s6  }
  0x68   : > { %s3981_s5 = sld [smem:[#allocation51_spill]]  ;;  %s538_s15 = scalar_lea.vmem [#allocation12], %s3133_s20 }
  0x69   : > { %s545_s4 = sshll.u32 %s538_s15, 4  ;;  %s546_s4 = int_to_ptr.vmem [resolvable:$true] %s545_s4 }
  0x6e   : > { %s3238_s1 = scalar_lea.hbm %s3981_s5, %s3203_s26  ;;  %s2499_s2 = scalar_lea.hbm %s3981_s5, 32 }
  0x6f   : > { %s2494_s10 = scalar_lea.hbm %s3238_s1, 16  ;;  %p2500_p7 = scmp.lt.u32.totalorder %s3238_s1, %s3981_s5 }
  0x70   : > { %p2495_p8 = scmp.ne.s32.totalorder %s3238_s1, %s2494_s10  ;;  %p2501_p9 = scmp.lt.u32.totalorder %s2499_s2, %s2494_s10 }
  0x71   : > { %p2503_p0 = scmp.lt.u32.totalorder %s2494_s10, %s3238_s1 }
  0x72   : > { %p2497_p13 = pnand %p2495_p8, %p3161_p6  ;;  %p2502_p10 = por %p2501_p9, %p2500_p7 }
  0x74   : > { %p2498_p5 = pneg %p2497_p13  ;;  %p2504_p2 = por %p2503_p0, %p2502_p10 }
  0x76   : > { %p2505_p11 = pnand %p2504_p2, %p2498_p5 }
  0x78   : > { %2508 = shalt.err (!%p2505_p11)
}
  0x79   : > { %s2509_s15 = scalar_lea.vmem %s546_s4, 16  ;;  %s2976_s13 = smov [#allocation12]  }
  0x7a   : > { %p2510_p12 = scmp.ne.s32.totalorder %s546_s4, %s2509_s15  ;;  %s2514_s3 = sshll.u32 %s2976_s13, 4  ;;  %s2515_s3 = int_to_ptr.vmem [resolvable:$false] %s2514_s3 }
  0x7b   : > { %s2516_s25 = scalar_lea.vmem %s2515_s3, 32  ;;  %p2517_p8 = scmp.lt.s32.totalorder %s546_s4, %s2515_s3 }
  0x7c   : > { %p2512_p1 = pnand %p2510_p12, %p3161_p6  ;;  %p2518_p13 = scmp.lt.s32.totalorder %s2516_s25, %s2509_s15 }
  0x7e   : > { %p2513_p3 = pneg %p2512_p1  ;;  %p2519_p4 = por %p2518_p13, %p2517_p8 }
  0x80   : > { %p2520_p7 = pnand %p2519_p4, %p2513_p3 }
  0x82   : > { %2523 = shalt.err (!%p2520_p7)
}
  0x83   : > { %p3982_p9 = scmp.ne.s32.totalorder %s3973_s12, 0  ;;  %s3983_s10 = scalar_lea.sflag [#allocation13], %s3130_s19 }
  0x84   : > { %s3984_s7 = sld [smem:[#allocation53_spill]]  ;;  %s573_s3 = scalar_lea.vmem [#allocation15], %s3136_s21 }
  0x85   : > { %2276 = dma.hbm_to_vmem [thread:$0]  (!%p3982_p9), %s3238_s1, 16, %s546_s4, %s3983_s10  }
  0x86   : > { %s580_s24 = sshll.u32 %s573_s3, 4  ;;  %s3936_s8 = scalar_lea.sflag [#allocation16], %s3130_s19  ;;  %s3268_s24 = int_to_ptr.vmem [resolvable:$true] %s580_s24 }
  0x8a   : > { %s3265_s13 = scalar_lea.hbm %s3984_s7, %s3139_s22  ;;  %s2529_s25 = scalar_lea.hbm %s3984_s7, 512 }
  0x8b   : > { %s2524_s15 = scalar_lea.hbm %s3265_s13, 256  ;;  %p2530_p0 = scmp.lt.u32.totalorder %s3265_s13, %s3984_s7 }
  0x8c   : > { %p2525_p4 = scmp.ne.s32.totalorder %s3265_s13, %s2524_s15  ;;  %p2531_p2 = scmp.lt.u32.totalorder %s2529_s25, %s2524_s15 }
  0x8d   : > { %p2533_p12 = scmp.lt.u32.totalorder %s2524_s15, %s3265_s13 }
  0x8e   : > { %p2527_p5 = pnand %p2525_p4, %p3161_p6  ;;  %p2532_p11 = por %p2531_p2, %p2530_p0 }
  0x90   : > { %p2528_p10 = pneg %p2527_p5  ;;  %p2534_p1 = por %p2533_p12, %p2532_p11 }
  0x92   : > { %p2535_p3 = pnand %p2534_p1, %p2528_p10 }
  0x94   : > { %2538 = shalt.err (!%p2535_p3)
}
  0x95   : > { %s2539_s21 = scalar_lea.vmem %s3268_s24, 256  ;;  %s2977_s0 = smov [#allocation15]  }
  0x96   : > { %p2540_p8 = scmp.ne.s32.totalorder %s3268_s24, %s2539_s21  ;;  %s2544_s2 = sshll.u32 %s2977_s0, 4  ;;  %s2545_s2 = int_to_ptr.vmem [resolvable:$false] %s2544_s2 }
  0x97   : > { %s2546_s3 = scalar_lea.vmem %s2545_s2, 512  ;;  %p2547_p4 = scmp.lt.s32.totalorder %s3268_s24, %s2545_s2 }
  0x98   : > { %p2542_p13 = pnand %p2540_p8, %p3161_p6  ;;  %p2548_p5 = scmp.lt.s32.totalorder %s2546_s3, %s2539_s21 }
  0x9a   : > { %p2543_p7 = pneg %p2542_p13  ;;  %p2549_p0 = por %p2548_p5, %p2547_p4 }
  0x9c   : > { %p2550_p2 = pnand %p2549_p0, %p2543_p7 }
  0x9e   : > { %2553 = shalt.err (!%p2550_p2)
}
  0x9f   : > { %2282 = dma.hbm_to_vmem [thread:$0]  (!%p3982_p9), %s3265_s13, 256, %s3268_s24, %s3936_s8, %s3980_s14, %s3980_s14, %s3979_s6  }
  0xa0   : > { %s2063_s15 = sshll.u32 %s3133_s20, 5  ;;  %s2115_s1 = sshll.u32 %s2962_s16, 9 }
  0xa1   : > { %s3985_s9 = sld [smem:[#allocation55_spill]]  ;;  %s611_s10 = scalar_lea.vmem [#allocation18], %s2063_s15 }
  0xa2   : > { %s618_s21 = sshll.u32 %s611_s10, 4  ;;  %s3935_s0 = scalar_lea.sflag [#allocation19], %s3130_s19  ;;  %s3304_s21 = int_to_ptr.vmem [resolvable:$true] %s618_s21 }
  0xa7   : > { %s3302_s22 = scalar_lea.hbm %s3985_s9, %s2115_s1  ;;  %s2559_s3 = scalar_lea.hbm %s3985_s9, 1024 }
  0xa8   : > { %s2554_s2 = scalar_lea.hbm %s3302_s22, 512  ;;  %p2560_p1 = scmp.lt.u32.totalorder %s3302_s22, %s3985_s9 }
  0xa9   : > { %p2555_p10 = scmp.ne.s32.totalorder %s3302_s22, %s2554_s2  ;;  %p2561_p3 = scmp.lt.u32.totalorder %s2559_s3, %s2554_s2 }
  0xaa   : > { %p2563_p13 = scmp.lt.u32.totalorder %s2554_s2, %s3302_s22 }
  0xab   : > { %p2557_p11 = pnand %p2555_p10, %p3161_p6  ;;  %p2562_p8 = por %p2561_p3, %p2560_p1 }
  0xad   : > { %p2558_p12 = pneg %p2557_p11  ;;  %p2564_p7 = por %p2563_p13, %p2562_p8 }
  0xaf   : > { %p2565_p4 = pnand %p2564_p7, %p2558_p12 }
  0xb1   : > { %2568 = shalt.err (!%p2565_p4)
}
  0xb2   : > { %s2569_s15 = scalar_lea.vmem %s3304_s21, 512  ;;  %s2978_s25 = smov [#allocation18]  }
  0xb3   : > { %p2570_p5 = scmp.ne.s32.totalorder %s3304_s21, %s2569_s15  ;;  %s2574_s10 = sshll.u32 %s2978_s25, 4  ;;  %s2575_s10 = int_to_ptr.vmem [resolvable:$false] %s2574_s10 }
  0xb4   : > { %s2576_s13 = scalar_lea.vmem %s2575_s10, 1024  ;;  %p2577_p10 = scmp.lt.s32.totalorder %s3304_s21, %s2575_s10 }
  0xb5   : > { %p2572_p0 = pnand %p2570_p5, %p3161_p6  ;;  %p2578_p11 = scmp.lt.s32.totalorder %s2576_s13, %s2569_s15 }
  0xb7   : > { %p2573_p2 = pneg %p2572_p0  ;;  %p2579_p1 = por %p2578_p11, %p2577_p10 }
  0xb9   : > { %p2580_p3 = pnand %p2579_p1, %p2573_p2 }
  0xbb   : > { %2583 = shalt.err (!%p2580_p3)
}
  0xbc   : > { %2288 = dma.hbm_to_vmem [thread:$0]  (!%p3982_p9), %s3302_s22, 512, %s3304_s21, %s3935_s0, %s3980_s14, %s3980_s14, %s3979_s6  }
  0xbd   : > { %s3986_s11 = sld [smem:[#allocation57_spill]]  ;;  %s648_s1 = scalar_lea.vmem [#allocation21], %s3133_s20 }
  0xbe   : > { %s655_s4 = sshll.u32 %s648_s1, 4  ;;  %s3934_s15 = scalar_lea.sflag [#allocation22], %s3130_s19  ;;  %s656_s4 = int_to_ptr.vmem [resolvable:$true] %s655_s4 }
  0xc3   : > { %s3337_s3 = scalar_lea.hbm %s3986_s11, %s3203_s26  ;;  %s2589_s14 = scalar_lea.hbm %s3986_s11, 32 }
  0xc4   : > { %s2584_s25 = scalar_lea.hbm %s3337_s3, 16  ;;  %p2590_p7 = scmp.lt.u32.totalorder %s3337_s3, %s3986_s11 }
  0xc5   : > { %p2585_p12 = scmp.ne.s32.totalorder %s3337_s3, %s2584_s25  ;;  %p2591_p4 = scmp.lt.u32.totalorder %s2589_s14, %s2584_s25 }
  0xc6   : > { %p2593_p0 = scmp.lt.u32.totalorder %s2584_s25, %s3337_s3 }
  0xc7   : > { %p2587_p8 = pnand %p2585_p12, %p3161_p6  ;;  %p2592_p5 = por %p2591_p4, %p2590_p7 }
  0xc9   : > { %p2588_p13 = pneg %p2587_p8  ;;  %p2594_p2 = por %p2593_p0, %p2592_p5 }
  0xcb   : > { %p2595_p10 = pnand %p2594_p2, %p2588_p13 }
  0xcd   : > { %2598 = shalt.err (!%p2595_p10)
}
  0xce   : > { %s2599_s13 = scalar_lea.vmem %s656_s4, 16  ;;  %s2979_s2 = smov [#allocation21]  }
  0xcf   : > { %p2600_p11 = scmp.ne.s32.totalorder %s656_s4, %s2599_s13  ;;  %s2604_s24 = sshll.u32 %s2979_s2, 4  ;;  %s2605_s24 = int_to_ptr.vmem [resolvable:$false] %s2604_s24 }
  0xd0   : > { %s2606_s1 = scalar_lea.vmem %s2605_s24, 32  ;;  %p2607_p12 = scmp.lt.s32.totalorder %s656_s4, %s2605_s24 }
  0xd1   : > { %p2602_p1 = pnand %p2600_p11, %p3161_p6  ;;  %p2608_p8 = scmp.lt.s32.totalorder %s2606_s1, %s2599_s13 }
  0xd3   : > { %p2603_p3 = pneg %p2602_p1  ;;  %p2609_p9 = por %p2608_p8, %p2607_p12 }
  0xd5   : > { %p2610_p4 = pnand %p2609_p9, %p2603_p3 }
  0xd7   : > { %2613 = shalt.err (!%p2610_p4)
}
  0xd8   : > { %p3987_p7 = scmp.ne.s32.totalorder %s3973_s12, 0  ;;  %s3361_s25 = sadd.s32 4294967295, %s2970_s18  }
  0xd9   : > { %s2044_s10 = sadd.s32 4294967294, %s2970_s18   ;;  %s56_s6 = sadd.s32 1, %s2962_s16 }
  0xda   : > { %2294 = dma.hbm_to_vmem [thread:$0]  (!%p3987_p7), %s3337_s3, 16, %s656_s4, %s3934_s15  }
  0xdb   : > { %p57_p9 = scmp.ge.s32.totalorder %s56_s6, 2  ;;  %s3988_s14 = sld [smem:[#allocation33_spill]] }
  0xdc   : > { %s3989_s22 = sld [smem:[#allocation34_spill]]  ;;  %s59_s21 = sadd.s32 1, %s2966_s17 }
  0xdd   : > { %s66_s13 = sadd.s32 1, %s2950_s30  ;;  %p73_p13 = scmp.ne.s32.totalorder %s2950_s30, %s2946_s29 }
  0xde   : > { %s4046_s6 = smov (%p57_p9, %s56_s6), 0  ;;  %s4048_s21 = smov (!%p57_p9, %s59_s21), %s2966_s17 }
  0xdf   : > { %3990 = sst [smem:[#allocation42_spill]] %s4046_s6  ;;  %p3991_p5 = scmp.eq.s32.totalorder %s2970_s18, 0 }
  0xe0   : > { %p79_p2 = scmp.ne.s32.totalorder %s2946_s29, %s2942_s28  ;;  %p61_p10 = scmp.ge.s32.totalorder %s4048_s21, 2 }
  0xe1   : > { %p3377_p0 = por %p3991_p5, %p73_p13  ;;  %p80_p11 = scmp.eq.s32.totalorder %s3361_s25, 0 }
  0xe2   : > { %s89_s4 = ssub.s32 %s2962_s16, %s4046_s6  ;;  %s92_s2 = sadd.s32 1, %s2938_s27 }
  0xe3   : > { %s4050_s21 = smov (%p61_p10, %s4048_s21), 0  ;;  %p3392_p1 = por %p80_p11, %p79_p2 }
  0xe4   : > { %3993 = sst [smem:[#allocation43_spill]] %s4050_s21  ;;  %p90_p3 = scmp.eq.s32.totalorder %s89_s4, 0 }
  0xe5   : > { %s3994_s24 = scalar_select %p3392_p1, 1, 0 }
  0xe6   : > { %s63_s1 = ssub.s32 %s2966_s17, %s4050_s21  ;;  %p105_p12 = scmp.ne.s32.totalorder %s3989_s22, %s3988_s14 }
  0xe7   : > { %p64_p8 = scmp.eq.s32.totalorder %s63_s1, 0  ;;  %p415_p4 = scmp.eq.s32.totalorder %s3361_s25, 3 }
  0xe8   : > { %s3402_s15 = scalar_select %p90_p3, %s2938_s27, %s92_s2  }
  0xe9   : > { %s3405_s0 = scalar_select %p64_p8, %s2950_s30, %s66_s13  }
  0xea   : > { %3995 = sst [smem:[#allocation44_spill]] %s3402_s15  ;;  %p3407_p9 = por %p105_p12, %p80_p11 }
  0xeb   : > { %3996 = sst [smem:[#allocation45_spill]] %s3405_s0  ;;  %p3414_p5 = por %p415_p4, %p73_p13 }
  0xec   : > { %s3997_s8 = scalar_select %p3407_p9, 1, 0 }
  0xed   : > { %s3998_s5 = scalar_select %p3414_p5, 1, 0 }
  0xee   : > { %p421_p10 = scmp.eq.s32.totalorder %s2044_s10, 3  ;;  %s441_s14 = sand.u32 1, %s2950_s30  }
  0xef   : > { %s2047_s22 = sshll.u32 %s441_s14, 2  ;;  %s2048_s2 = sshll.u32 %s2966_s17, 6 }
  0xf0   : > { %p3422_p1 = por %p421_p10, %p79_p2  ;;  %s445_s13 = scalar_lea.vmem [#allocation3], %s2047_s22 }
  0xf1   : > { %s452_s1 = sshll.u32 %s445_s13, 4  ;;  %s4000_s11 = sld [smem:[#allocation46_spill]]  ;;  %s3432_s1 = int_to_ptr.vmem [resolvable:$true] %s452_s1 }
  0xf2   : > { %s3999_s4 = scalar_select %p3422_p1, 1, 0 }
  0xf3   : > { %p4001_p13 = scmp.lt.s32.totalorder %s2970_s18, 4  ;;  %s4003_s13 = sld [smem:[#allocation48_spill]] }
  0xf4   : > { %s483_s9 = scalar_lea.vmem [#allocation8], %s3133_s20  ;;  %s442_s17 = scalar_lea.sflag [#allocation4], %s441_s14 }
  0xf5   : > { %p3438_p2 = pnand %p4001_p13, %p3377_p0 }
  0xf7   : > { %s3430_s21 = scalar_lea.hbm %s4000_s11, %s2048_s2  ;;  %s490_s2 = sshll.u32 %s483_s9, 4  ;;  %s3449_s2 = int_to_ptr.vmem [resolvable:$true] %s490_s2 }
  0xf8   : > { %s2614_s16 = scalar_lea.hbm %s3430_s21, 64  ;;  %p2616_p3 = pneg %p3438_p2 }
  0xf9   : > { %s3446_s7 = scalar_lea.hbm %s4003_s13, %s3203_s26  ;;  %p2615_p11 = scmp.ne.s32.totalorder %s3430_s21, %s2614_s16 }
  0xfa   : > { %s2619_s6 = scalar_lea.hbm %s4000_s11, 128  ;;  %p2620_p8 = scmp.lt.u32.totalorder %s3430_s21, %s4000_s11 }
  0xfb   : > { %p2617_p0 = pnand %p2616_p3, %p2615_p11  ;;  %p2621_p4 = scmp.lt.u32.totalorder %s2619_s6, %s2614_s16 }
  0xfc   : > { %p2623_p13 = scmp.lt.u32.totalorder %s2614_s16, %s3430_s21 }
  0xfd   : > { %p2618_p12 = pneg %p2617_p0  ;;  %p2622_p10 = por %p2621_p4, %p2620_p8 }
  0xff   : > { %p2624_p1 = por %p2623_p13, %p2622_p10 }
 0x101   : > { %p2625_p5 = pnand %p2624_p1, %p2618_p12 }
 0x103   : > { %2628 = shalt.err (!%p2625_p5)
}
 0x104   : > { %s2629_s14 = scalar_lea.vmem %s3432_s1, 64  ;;  %s2980_s0 = smov [#allocation3]  }
 0x105   : > { %p2630_p11 = scmp.ne.s32.totalorder %s3432_s1, %s2629_s14  ;;  %s2634_s9 = sshll.u32 %s2980_s0, 4  ;;  %s2635_s9 = int_to_ptr.vmem [resolvable:$false] %s2634_s9 }
 0x106   : > { %s2636_s30 = scalar_lea.vmem %s2635_s9, 128  ;;  %p2637_p7 = scmp.lt.s32.totalorder %s3432_s1, %s2635_s9 }
 0x107   : > { %p2632_p0 = pnand %p2630_p11, %p2616_p3  ;;  %p2638_p8 = scmp.lt.s32.totalorder %s2636_s30, %s2629_s14 }
 0x109   : > { %p2633_p9 = pneg %p2632_p0  ;;  %p2639_p4 = por %p2638_p8, %p2637_p7 }
 0x10b   : > { %p2640_p10 = pnand %p2639_p4, %p2633_p9 }
 0x10d   : > { %2643 = shalt.err (!%p2640_p10)
}
 0x10e   : > { %2261 = dma.hbm_to_vmem [thread:$0]  (!%p3438_p2), %s3430_s21, 64, %s3432_s1, %s442_s17  }
 0x10f   : > { %s2644_s16 = scalar_lea.hbm %s3446_s7, 16  ;;  %s2649_s22 = scalar_lea.hbm %s4003_s13, 32 }
 0x110   : > { %p2645_p1 = scmp.ne.s32.totalorder %s3446_s7, %s2644_s16  ;;  %p2650_p7 = scmp.lt.u32.totalorder %s3446_s7, %s4003_s13 }
 0x111   : > { %p2651_p9 = scmp.lt.u32.totalorder %s2649_s22, %s2644_s16  ;;  %p2653_p13 = scmp.lt.u32.totalorder %s2644_s16, %s3446_s7 }
 0x112   : > { %p2647_p5 = pnand %p2645_p1, %p3161_p6 }
 0x113   : > { %p2652_p12 = por %p2651_p9, %p2650_p7 }
 0x114   : > { %p2648_p3 = pneg %p2647_p5 }
 0x115   : > { %p2654_p11 = por %p2653_p13, %p2652_p12 }
 0x117   : > { %p2655_p0 = pnand %p2654_p11, %p2648_p3 }
 0x119   : > { %2658 = shalt.err (!%p2655_p0)
}
 0x11a   : > { %s2659_s17 = scalar_lea.vmem %s3449_s2, 16  ;;  %s2981_s21 = smov [#allocation8]  }
 0x11b   : > { %p2660_p2 = scmp.ne.s32.totalorder %s3449_s2, %s2659_s17  ;;  %s2664_s1 = sshll.u32 %s2981_s21, 4  ;;  %s2665_s1 = int_to_ptr.vmem [resolvable:$false] %s2664_s1 }
 0x11c   : > { %s2666_s10 = scalar_lea.vmem %s2665_s1, 32  ;;  %p2667_p10 = scmp.lt.s32.totalorder %s3449_s2, %s2665_s1 }
 0x11d   : > { %p2662_p8 = pnand %p2660_p2, %p3161_p6  ;;  %p2668_p1 = scmp.lt.s32.totalorder %s2666_s10, %s2659_s17 }
 0x11f   : > { %p2663_p4 = pneg %p2662_p8  ;;  %p2669_p5 = por %p2668_p1, %p2667_p10 }
 0x121   : > { %p2670_p7 = pnand %p2669_p5, %p2663_p4 }
 0x123   : > { %2673 = shalt.err (!%p2670_p7)
}
 0x124   : > { %p4004_p3 = scmp.ne.s32.totalorder %s3973_s12, 0  ;;  %s4005_s9 = scalar_lea.sflag [#allocation7], %s3130_s19 }
 0x125   : > { %s4006_s3 = sld [smem:[#allocation50_spill]]  ;;  %s521_s22 = scalar_lea.vmem [#allocation11], %s3133_s20 }
 0x126   : > { %2267 = dma.hbm_to_vmem [thread:$0]  (!%p4004_p3), %s3446_s7, 16, %s3449_s2, %s4005_s9  }
 0x127   : > { %s528_s14 = sshll.u32 %s521_s22, 4  ;;  %s4007_s21 = sld [smem:[#allocation52_spill]]  ;;  %s529_s14 = int_to_ptr.vmem [resolvable:$true] %s528_s14 }
 0x12b   : > { %s3503_s6 = scalar_lea.hbm %s4006_s3, %s3203_s26  ;;  %s2679_s9 = scalar_lea.hbm %s4006_s3, 32 }
 0x12c   : > { %s2674_s10 = scalar_lea.hbm %s3503_s6, 16  ;;  %p2680_p11 = scmp.lt.u32.totalorder %s3503_s6, %s4006_s3 }
 0x12d   : > { %s3510_s1 = scalar_lea.hbm %s4007_s21, %s3203_s26  ;;  %p2675_p9 = scmp.ne.s32.totalorder %s3503_s6, %s2674_s10 }
 0x12e   : > { %p2681_p0 = scmp.lt.u32.totalorder %s2679_s9, %s2674_s10  ;;  %p2683_p8 = scmp.lt.u32.totalorder %s2674_s10, %s3503_s6 }
 0x12f   : > { %p2677_p12 = pnand %p2675_p9, %p3161_p6 }
 0x130   : > { %p2682_p2 = por %p2681_p0, %p2680_p11 }
 0x131   : > { %p2678_p13 = pneg %p2677_p12 }
 0x132   : > { %p2684_p4 = por %p2683_p8, %p2682_p2 }
 0x134   : > { %p2685_p10 = pnand %p2684_p4, %p2678_p13 }
 0x136   : > { %2688 = shalt.err (!%p2685_p10)
}
 0x137   : > { %s2689_s22 = scalar_lea.vmem %s529_s14, 16  ;;  %s2982_s0 = smov [#allocation11]  }
 0x138   : > { %p2690_p1 = scmp.ne.s32.totalorder %s529_s14, %s2689_s22  ;;  %s2694_s17 = sshll.u32 %s2982_s0, 4  ;;  %s2695_s17 = int_to_ptr.vmem [resolvable:$false] %s2694_s17 }
 0x139   : > { %s2696_s7 = scalar_lea.vmem %s2695_s17, 32  ;;  %p2697_p9 = scmp.lt.s32.totalorder %s529_s14, %s2695_s17 }
 0x13a   : > { %p2692_p5 = pnand %p2690_p1, %p3161_p6  ;;  %p2698_p12 = scmp.lt.s32.totalorder %s2696_s7, %s2689_s22 }
 0x13c   : > { %p2693_p7 = pneg %p2692_p5  ;;  %p2699_p3 = por %p2698_p12, %p2697_p9 }
 0x13e   : > { %p2700_p0 = pnand %p2699_p3, %p2693_p7 }
 0x140   : > { %2703 = shalt.err (!%p2700_p0)
}
 0x141   : > { %p4008_p11 = scmp.ne.s32.totalorder %s3973_s12, 0  ;;  %s4009_s10 = scalar_lea.sflag [#allocation10], %s3130_s19 }
 0x142   : > { %s555_s2 = scalar_lea.vmem [#allocation14], %s3133_s20  ;;  %s4010_s22 = sld [smem:[#allocation54_spill]] }
 0x143   : > { %2273 = dma.hbm_to_vmem [thread:$0]  (!%p4008_p11), %s3503_s6, 16, %s529_s14, %s4009_s10  }
 0x144   : > { %s562_s9 = sshll.u32 %s555_s2, 4  ;;  %s2704_s17 = scalar_lea.hbm %s3510_s1, 16  ;;  %s563_s9 = int_to_ptr.vmem [resolvable:$true] %s562_s9 }
 0x145   : > { %p2705_p3 = scmp.ne.s32.totalorder %s3510_s1, %s2704_s17  ;;  %s2709_s11 = scalar_lea.hbm %s4007_s21, 32 }
 0x146   : > { %p2710_p8 = scmp.lt.u32.totalorder %s3510_s1, %s4007_s21  ;;  %p2711_p4 = scmp.lt.u32.totalorder %s2709_s11, %s2704_s17 }
 0x147   : > { %p2707_p13 = pnand %p2705_p3, %p3161_p6  ;;  %p2713_p1 = scmp.lt.u32.totalorder %s2704_s17, %s3510_s1 }
 0x148   : > { %s3536_s0 = scalar_lea.hbm %s4010_s22, %s3203_s26  ;;  %p2712_p10 = por %p2711_p4, %p2710_p8 }
 0x149   : > { %p2708_p2 = pneg %p2707_p13 }
 0x14a   : > { %p2714_p5 = por %p2713_p1, %p2712_p10 }
 0x14c   : > { %p2715_p7 = pnand %p2714_p5, %p2708_p2 }
 0x14e   : > { %2718 = shalt.err (!%p2715_p7)
}
 0x14f   : > { %s2719_s6 = scalar_lea.vmem %s563_s9, 16  ;;  %s2983_s14 = smov [#allocation14]  }
 0x150   : > { %p2720_p9 = scmp.ne.s32.totalorder %s563_s9, %s2719_s6  ;;  %s2724_s10 = sshll.u32 %s2983_s14, 4  ;;  %s2725_s10 = int_to_ptr.vmem [resolvable:$false] %s2724_s10 }
 0x151   : > { %s2726_s3 = scalar_lea.vmem %s2725_s10, 32  ;;  %p2727_p3 = scmp.lt.s32.totalorder %s563_s9, %s2725_s10 }
 0x152   : > { %p2722_p12 = pnand %p2720_p9, %p3161_p6  ;;  %p2728_p13 = scmp.lt.s32.totalorder %s2726_s3, %s2719_s6 }
 0x154   : > { %p2723_p0 = pneg %p2722_p12  ;;  %p2729_p11 = por %p2728_p13, %p2727_p3 }
 0x156   : > { %p2730_p4 = pnand %p2729_p11, %p2723_p0 }
 0x158   : > { %2733 = shalt.err (!%p2730_p4)
}
 0x159   : > { %p4011_p8 = scmp.ne.s32.totalorder %s3973_s12, 0  ;;  %s4012_s11 = scalar_lea.sflag [#allocation13], %s3130_s19 }
 0x15a   : > { %s593_s15 = scalar_lea.vmem [#allocation17], %s3133_s20  ;;  %s4013_s16 = sld [smem:[#allocation56_spill]] }
 0x15b   : > { %2279 = dma.hbm_to_vmem [thread:$0]  (!%p4011_p8), %s3510_s1, 16, %s563_s9, %s4012_s11  }
 0x15c   : > { %s600_s13 = sshll.u32 %s593_s15, 4  ;;  %s2734_s6 = scalar_lea.hbm %s3536_s0, 16  ;;  %s601_s13 = int_to_ptr.vmem [resolvable:$true] %s600_s13 }
 0x15d   : > { %p2735_p11 = scmp.ne.s32.totalorder %s3536_s0, %s2734_s6  ;;  %s2739_s3 = scalar_lea.hbm %s4010_s22, 32 }
 0x15e   : > { %p2740_p1 = scmp.lt.u32.totalorder %s3536_s0, %s4010_s22  ;;  %p2741_p5 = scmp.lt.u32.totalorder %s2739_s3, %s2734_s6 }
 0x15f   : > { %p2737_p2 = pnand %p2735_p11, %p3161_p6  ;;  %p2743_p9 = scmp.lt.u32.totalorder %s2734_s6, %s3536_s0 }
 0x160   : > { %s4014_s7 = smov %s4013_s16  ;;  %s3562_s17 = scalar_lea.hbm %s4013_s16, %s3203_s26 }
 0x161   : > { %p2738_p10 = pneg %p2737_p2  ;;  %p2742_p7 = por %p2741_p5, %p2740_p1 }
 0x163   : > { %p2744_p12 = por %p2743_p9, %p2742_p7 }
 0x165   : > { %p2745_p0 = pnand %p2744_p12, %p2738_p10 }
 0x167   : > { %2748 = shalt.err (!%p2745_p0)
}
 0x168   : > { %s2749_s1 = scalar_lea.vmem %s601_s13, 16  ;;  %s2984_s9 = smov [#allocation17]  }
 0x169   : > { %p2750_p3 = scmp.ne.s32.totalorder %s601_s13, %s2749_s1  ;;  %s2754_s11 = sshll.u32 %s2984_s9, 4  ;;  %s2755_s11 = int_to_ptr.vmem [resolvable:$false] %s2754_s11 }
 0x16a   : > { %s2756_s15 = scalar_lea.vmem %s2755_s11, 32  ;;  %p2757_p11 = scmp.lt.s32.totalorder %s601_s13, %s2755_s11 }
 0x16b   : > { %p2752_p13 = pnand %p2750_p3, %p3161_p6  ;;  %p2758_p2 = scmp.lt.s32.totalorder %s2756_s15, %s2749_s1 }
 0x16d   : > { %p2753_p4 = pneg %p2752_p13  ;;  %p2759_p8 = por %p2758_p2, %p2757_p11 }
 0x16f   : > { %p2760_p1 = pnand %p2759_p8, %p2753_p4 }
 0x171   : > { %2763 = shalt.err (!%p2760_p1)
}
 0x172   : > { %p4015_p5 = scmp.ne.s32.totalorder %s3973_s12, 0  ;;  %s4016_s27 = scalar_lea.sflag [#allocation16], %s3130_s19 }
 0x173   : > { %s631_s21 = scalar_lea.vmem [#allocation20], %s3133_s20  ;;  %s4017_s6 = sld [smem:[#allocation58_spill]] }
 0x174   : > { %2285 = dma.hbm_to_vmem [thread:$0]  (!%p4015_p5), %s3536_s0, 16, %s601_s13, %s4016_s27  }
 0x175   : > { %s638_s2 = sshll.u32 %s631_s21, 4  ;;  %s2764_s10 = scalar_lea.hbm %s3562_s17, 16  ;;  %s639_s2 = int_to_ptr.vmem [resolvable:$true] %s638_s2 }
 0x176   : > { %p2765_p8 = scmp.ne.s32.totalorder %s3562_s17, %s2764_s10  ;;  %s2769_s9 = scalar_lea.hbm %s4014_s7, 32 }
 0x177   : > { %p2770_p9 = scmp.lt.u32.totalorder %s3562_s17, %s4014_s7  ;;  %p2771_p12 = scmp.lt.u32.totalorder %s2769_s9, %s2764_s10 }
 0x178   : > { %p2767_p10 = pnand %p2765_p8, %p3161_p6  ;;  %p2773_p3 = scmp.lt.u32.totalorder %s2764_s10, %s3562_s17 }
 0x179   : > { %s3588_s14 = scalar_lea.hbm %s4017_s6, %s3203_s26  ;;  %p2772_p0 = por %p2771_p12, %p2770_p9 }
 0x17a   : > { %p2768_p7 = pneg %p2767_p10 }
 0x17b   : > { %p2774_p13 = por %p2773_p3, %p2772_p0 }
 0x17d   : > { %p2775_p4 = pnand %p2774_p13, %p2768_p7 }
 0x17f   : > { %2778 = shalt.err (!%p2775_p4)
}
 0x180   : > { %s2779_s26 = scalar_lea.vmem %s639_s2, 16  ;;  %s2985_s0 = smov [#allocation20]  }
 0x181   : > { %p2780_p11 = scmp.ne.s32.totalorder %s639_s2, %s2779_s26  ;;  %s2784_s13 = sshll.u32 %s2985_s0, 4  ;;  %s2785_s13 = int_to_ptr.vmem [resolvable:$false] %s2784_s13 }
 0x182   : > { %s2786_s27 = scalar_lea.vmem %s2785_s13, 32  ;;  %p2787_p8 = scmp.lt.s32.totalorder %s639_s2, %s2785_s13 }
 0x183   : > { %p2782_p2 = pnand %p2780_p11, %p3161_p6  ;;  %p2788_p10 = scmp.lt.s32.totalorder %s2786_s27, %s2779_s26 }
 0x185   : > { %p2783_p1 = pneg %p2782_p2  ;;  %p2789_p5 = por %p2788_p10, %p2787_p8 }
 0x187   : > { %p2790_p9 = pnand %p2789_p5, %p2783_p1 }
 0x189   : > { %2793 = shalt.err (!%p2790_p9)
}
 0x18a   : > { %p4018_p12 = scmp.ne.s32.totalorder %s3973_s12, 0  ;;  %s4019_s21 = scalar_lea.sflag [#allocation19], %s3130_s19 }
 0x18b   : > { %s665_s30 = scalar_lea.vmem [#allocation23], %s3133_s20  ;;  %s2794_s10 = scalar_lea.hbm %s3588_s14, 16 }
 0x18c   : > { %2291 = dma.hbm_to_vmem [thread:$0]  (!%p4018_p12), %s3562_s17, 16, %s639_s2, %s4019_s21  }
 0x18d   : > { %s672_s16 = sshll.u32 %s665_s30, 4  ;;  %p2795_p7 = scmp.ne.s32.totalorder %s3588_s14, %s2794_s10  ;;  %s673_s16 = int_to_ptr.vmem [resolvable:$true] %s672_s16 }
 0x18e   : > { %s2799_s9 = scalar_lea.hbm %s4017_s6, 32  ;;  %p2800_p3 = scmp.lt.u32.totalorder %s3588_s14, %s4017_s6 }
 0x18f   : > { %p2797_p5 = pnand %p2795_p7, %p3161_p6  ;;  %p2801_p13 = scmp.lt.u32.totalorder %s2799_s9, %s2794_s10 }
 0x190   : > { %p2803_p11 = scmp.lt.u32.totalorder %s2794_s10, %s3588_s14 }
 0x191   : > { %p2798_p0 = pneg %p2797_p5  ;;  %p2802_p4 = por %p2801_p13, %p2800_p3 }
 0x193   : > { %p2804_p2 = por %p2803_p11, %p2802_p4 }
 0x195   : > { %p2805_p1 = pnand %p2804_p2, %p2798_p0 }
 0x197   : > { %2808 = shalt.err (!%p2805_p1)
}
 0x198   : > { %s2809_s20 = scalar_lea.vmem %s673_s16, 16  ;;  %s2986_s17 = smov [#allocation23]  }
 0x199   : > { %p2810_p8 = scmp.ne.s32.totalorder %s673_s16, %s2809_s20  ;;  %s2814_s2 = sshll.u32 %s2986_s17, 4  ;;  %s2815_s2 = int_to_ptr.vmem [resolvable:$false] %s2814_s2 }
 0x19a   : > { %s2816_s26 = scalar_lea.vmem %s2815_s2, 32  ;;  %p2817_p7 = scmp.lt.s32.totalorder %s673_s16, %s2815_s2 }
 0x19b   : > { %p2812_p10 = pnand %p2810_p8, %p3161_p6  ;;  %p2818_p5 = scmp.lt.s32.totalorder %s2816_s26, %s2809_s20 }
 0x19d   : > { %p2813_p9 = pneg %p2812_p10  ;;  %p2819_p12 = por %p2818_p5, %p2817_p7 }
 0x19f   : > { %p2820_p3 = pnand %p2819_p12, %p2813_p9 }
 0x1a1   : > { %2823 = shalt.err (!%p2820_p3)
}
 0x1a2   : > { %p4020_p13 = scmp.ne.s32.totalorder %s3973_s12, 0  ;;  %s4021_s0 = scalar_lea.sflag [#allocation22], %s3130_s19 }
 0x1a3   : > { %s4022_s13 = sld [smem:[#allocation41_spill]] }
 0x1a4   : > { %2297 = dma.hbm_to_vmem [thread:$0]  (!%p4020_p13), %s3588_s14, 16, %s673_s16, %s4021_s0  }
 0x1a9   : > { %p4023_p0 = scmp.ne.s32.totalorder %s4022_s13, 0 }
 0x1aa   : > { %s3632_s23 = sand.u32 (!%p4023_p0), 1, %s2946_s29   ;;  %p4024_p6 = scmp.ne.s32.totalorder (!%p4023_p0), %s3994_s24, 0 }
 0x1ab   : > { %681 = sbr.rel (%p4023_p0) target bundleno = 3112 (0xc28), region = 72  ;;  %s2070_s27 = sshll.u32 (!%p4023_p0), %s3632_s23, 2 }
 0x1ac   : > { %s684_s21 = scalar_lea.sflag (!%p4023_p0), [#allocation4], %s3632_s23  ;;  %s3636_s30 = scalar_lea.vmem (!%p4023_p0), [#allocation3], %s2070_s27 }
 0x1b2   : > { %2897 = dma.done.wait (%p4024_p6), %s684_s21, 64  }
 0x1b3   : > { %2899 = vsyncadd (%p4024_p6), %s684_s21, 4294967232  ;;  %s4025_s12 = sld [smem:[#allocation34_spill]]  ;;  %s3643_s19 = sand.u32 1, %s3361_s25  }
 0x1b4   : > { %s693_s10 = scalar_lea.sflag [#allocation7], %s3643_s19  ;;  %p4026_p12 = scmp.ne.s32.totalorder %s3997_s8, 0 }
 0x1b9   : > { %s3646_s14 = sand.u32 1, %s4025_s12  }
 0x1ba   : > { %s3649_s16 = sshll.u32 %s3646_s14, 4 }
 0x1bb   : > { %s696_s3 = scalar_lea.vmem [#allocation6], %s3649_s16 }
 0x1bc   : > { %2901 = dma.done.wait (%p4026_p12), %s693_s10, 272  }
 0x1bd   : > { %2903 = vsyncadd (%p4026_p12), %s693_s10, 4294967024  ;;  %s704_s25 = scalar_lea.vmem [#allocation8], %s3646_s14  ;;  %s710_s24 = scalar_lea.sflag [#allocation10], %s3643_s19 }
 0x1be   : > { %s713_s1 = scalar_lea.vmem [#allocation9], %s3649_s16 }
 0x1bf   : > { %2905 = dma.done.wait (%p4026_p12), %s710_s24, 272  }
 0x1c0   : > { %2907 = vsyncadd (%p4026_p12), %s710_s24, 4294967024  ;;  %s721_s9 = scalar_lea.vmem [#allocation11], %s3646_s14  ;;  %s727_s11 = scalar_lea.sflag [#allocation13], %s3643_s19 }
 0x1c1   : > { %s729_s15 = scalar_lea.vmem [#allocation12], %s3646_s14 }
 0x1c2   : > { %2909 = dma.done.wait (%p4026_p12), %s727_s11, 32  }
 0x1c3   : > { %2911 = vsyncadd (%p4026_p12), %s727_s11, 4294967264  ;;  %s737_s20 = scalar_lea.vmem [#allocation14], %s3646_s14  ;;  %s743_s17 = scalar_lea.sflag [#allocation16], %s3643_s19 }
 0x1c4   : > { %s746_s2 = scalar_lea.vmem [#allocation15], %s3649_s16 }
 0x1c5   : > { %2913 = dma.done.wait (%p4026_p12), %s743_s17, 272  }
 0x1c6   : > { %2915 = vsyncadd (%p4026_p12), %s743_s17, 4294967024  ;;  %s2074_s26 = sshll.u32 %s3646_s14, 5  ;;  %s754_s0 = scalar_lea.vmem [#allocation17], %s3646_s14 }
 0x1c7   : > { %s760_s13 = scalar_lea.sflag [#allocation19], %s3643_s19  ;;  %s3681_s27 = scalar_lea.vmem [#allocation18], %s2074_s26 }
 0x1c8   : > { %2917 = dma.done.wait (%p4026_p12), %s760_s13, 528  }
 0x1c9   : > { %2919 = vsyncadd (%p4026_p12), %s760_s13, 4294966768  ;;  %s771_s21 = scalar_lea.vmem [#allocation20], %s3646_s14  ;;  %s777_s12 = scalar_lea.sflag [#allocation22], %s3643_s19 }
 0x1ca   : > { %s779_s10 = scalar_lea.vmem [#allocation21], %s3646_s14 }
 0x1cb   : > { %2921 = dma.done.wait (%p4026_p12), %s777_s12, 32  }
 0x1cc   : > { %2923 = vsyncadd (%p4026_p12), %s777_s12, 4294967264  ;;  %s2075_s24 = sshll.u32 %s3632_s23, 3  ;;  %s787_s11 = scalar_lea.vmem [#allocation23], %s3646_s14 }
 0x1cd   : > { %s3696_s17 = scalar_lea.vmem [#allocation24], %s2075_s24  ;;  %s4027_s26 = sld [smem:[#allocation37_spill]] }
 0x1d3   : > { %p2076_p4 = scmp.ne.s32.totalorder %s4027_s26, 0 }
 0x1d4   : > { %v887_v0 = vld [vmem:[%s3636_s30] sm:$0xf] (!%p2076_p4)  ;;  %vm889_vm0 = vcmask (!%p2076_p4), 261120  }
 0x1d5   : > { %886 = sbr.rel (%p2076_p4) target bundleno = 476 (0x1dc), region = 128  ;;  %v888_v1 = vunpack.c.l.bf16 (!%p2076_p4), %v887_v0 }
 0x1d7   : > { %890 = vst.msk [vmem:[#allocation2] sm:$0xff] (!%p2076_p4), %vm889_vm0, %v888_v1 }
 0x1dc PF: > { %v2404_v2 = vld [vmem:[%s696_s3] sm:$0xff]   ;;  %v2987_v3 = vmov 0.0   ;;  %v2405_v4 = vld [vmem:[%s696_s3 + $0x8] sm:$0xff]   ;;  %vm2988_vm1 = vmmov 0   ;;  %vm916_vm2 = vcmask 261120   ;;  %s2989_s8 = smov 104  }
 0x1dd   : > { %2146 = vmatprep.subr.bf16.mxu0 %v2987_v3  ;;  %2154 = vmatprep.subr.bf16.mxu1 %v2987_v3  ;;  %v2077_v7 = vld [vmem:[%s704_s25] ss:$0 sm:$0xff]  ;;  %s2990_s30 = smov 120   ;;  %s2991_s19 = smov 96   ;;  %vm979_vm3 = vcmask 64512   ;;  %vm1223_vm4 = vcmask 1043456  }
 0x1de   : > { %2147 = vmatpush3.bf16.msra.mxu0 %v2404_v2  ;;  %2150 = vmatprep.mubr.msk.bf16.mxu0 %vm2988_vm1, %v2987_v3  ;;  %v3708_v5 = vld [vmem:[#allocation2] sm:$0xff]  ;;  %s2992_s3 = smov 112   ;;  %s2993_s25 = smov 64   ;;  %vm1424_vm5 = vcmask 130048   ;;  %vm1426_vm6 = vcmask 195584   ;;  %vm1634_vm7 = vcmask 523264  }
 0x1df   : > { %2148 = vmatprep.subr.bf16.mxu0 %v2987_v3  ;;  %2156 = vmatprep.mubr.msk.bf16.mxu1 %vm2988_vm1, %v2987_v3  ;;  %v892_v6 = vpack.c.bf16 %v3708_v5, %v3708_v5  ;;  %s2994_s13 = smov 8   ;;  %s2995_s12 = smov 16  }
 0x1e0   : > { %s2996_s24 = smov 24   ;;  %s4028_s16 = sld [smem:[#allocation37_spill]] }
 0x1e2   : > { %2149 = vmatpush3.bf16.msra.mxu0 %v2405_v4 }
 0x1e3   : > { %2160 = vmatprep.subr.bf16.mxu0 %v2987_v3 }
 0x1e5   : > { %2151 = vmatmul.mubr.msk.bf16.vlgmr.msra.gmra.mrb[0].mxu0 %vm916_vm2, %v892_v6 }
 0x1e6   : > { %2162 = vmatprep.mubr.msk.bf16.mxu0 %vm2988_vm1, %v2987_v3  ;;  %p2107_p11 = scmp.ne.s32.totalorder %s4028_s16, 1 }
 0x2b8   : > { %v954_v8 = vpop.f32.mrb[0].mxu0 }
 0x2b9   : > { %v955_v9 = vadd.f32 %v2077_v7, %v954_v8  ;;  %v2152_v10 = vpop.f32.mrb[1].mxu0 }
 0x2ba   : > { %v957_v11 = vpop.f32.mrb[2].mxu0 }
 0x2bb   : > { %v3721_v12 = vpack.c.bf16 %v955_v9, %v955_v9  ;;  %v2153_v13 = vpop.f32.mrb[3].mxu0  ;;  %v960_v14 = vmul.f32 0.35355338, %v955_v9 }
 0x2bd   : > { %975 = vrot.lane.b32.xlu1 %v3721_v12, %s2989_s8  ;;  %971 = vrot.lane.b32.xlu0 %v3721_v12, %s2990_s30  ;;  %v961_v17 = vpack.c.bf16 %v960_v14, %v960_v14 }
 0x2c1   : > { %977 = vrot.lane.b32.xlu1 %v3721_v12, %s2991_s19  ;;  %973 = vrot.lane.b32.xlu0 %v3721_v12, %s2992_s3 }
 0x32f   : > { %v3727_v15 = vpop.permute.xlu1 %975  ;;  %v3729_v16 = vpop.permute.xlu0 %971 }
 0x330   : > { %1026 = vrot.lane.b32.xlu0 %v3729_v16, %s2991_s19 }
 0x333   : > { %v978_v18 = vpop.permute.xlu1 %977  ;;  %v3732_v19 = vpop.permute.xlu0 %973 }
 0x334   : > { %1074 = vrot.lane.b32.xlu1 %v3732_v19, %s2991_s19  ;;  %964 = vrot.lane.b32.xlu0 %v961_v17, %s2990_s30  ;;  %v984_v20 = vsel %vm979_vm3, %v978_v18, 0 }
 0x335   : > { %2155 = vmatpush3.bf16.xpose.msra.mxu1 %v984_v20 }
 0x336   : > { %2166 = vmatprep.subr.bf16.mxu1 %v2987_v3 }
 0x338   : > { %1122 = vrot.lane.b32.xlu1 %v3727_v15, %s2991_s19  ;;  %966 = vrot.lane.b32.xlu0 %v961_v17, %s2992_s3 }
 0x33c   : > { %968 = vrot.lane.b32.xlu1 %v961_v17, %s2989_s8  ;;  %2157 = vmatmul.mubr.msk.bf16.vlgmr.msra.gmra.mrb[0].mxu1 %vm979_vm3, %v961_v17 }
 0x33d   : > { %2168 = vmatprep.mubr.msk.bf16.mxu1 %vm2988_vm1, %v2987_v3 }
 0x3a2   : > { %v1027_v21 = vpop.permute.xlu0 %1026 }
 0x3a3   : > { %v1032_v22 = vsel %vm979_vm3, %v1027_v21, 0 }
 0x3a4   : > { %2161 = vmatpush3.bf16.xpose.msra.mxu0 %v1032_v22 }
 0x3a5   : > { %2172 = vmatprep.subr.bf16.mxu0 %v2987_v3 }
 0x3a6   : > { %v1075_v23 = vpop.permute.xlu1 %1074  ;;  %v965_v25 = vpop.permute.xlu0 %964 }
 0x3a7   : > { %v1080_v24 = vsel %vm979_vm3, %v1075_v23, 0 }
 0x3a8   : > { %2167 = vmatpush3.bf16.xpose.msra.mxu1 %v1080_v24 }
 0x3a9   : > { %2178 = vmatprep.subr.bf16.mxu1 %v2987_v3 }
 0x3aa   : > { %v1123_v26 = vpop.permute.xlu1 %1122  ;;  %v967_v28 = vpop.permute.xlu0 %966 }
 0x3ab   : > { %v1128_v27 = vsel %vm979_vm3, %v1123_v26, 0  ;;  %2163 = vmatmul.mubr.msk.bf16.vlgmr.msra.gmra.mrb[4].mxu0 %vm979_vm3, %v965_v25 }
 0x3ac   : > { %2173 = vmatpush3.bf16.xpose.msra.mxu0 %v1128_v27  ;;  %2174 = vmatprep.mubr.msk.bf16.mxu0 %vm2988_vm1, %v2987_v3 }
 0x3ad   : > { %2184 = vmatprep.subr.bf16.mxu0 %v2987_v3 }
 0x3ae   : > { %v969_v29 = vpop.permute.xlu1 %968 }
 0x3af   : > { %2169 = vmatmul.mubr.msk.bf16.vlgmr.msra.gmra.mrb[4].mxu1 %vm979_vm3, %v967_v28 }
 0x3b0   : > { %2180 = vmatprep.mubr.msk.bf16.mxu1 %vm2988_vm1, %v2987_v3 }
 0x3b3   : > { %2175 = vmatmul.mubr.msk.bf16.vlgmr.msra.gmra.mrb[8].mxu0 %vm979_vm3, %v969_v29 }
 0x3b4   : > { %2186 = vmatprep.mubr.msk.bf16.mxu0 %vm2988_vm1, %v2987_v3 }
 0x40f   : > { %v1020_v30 = vpop.f32.mrb[0].mxu1 }
 0x410   : > { %v2158_v31 = vpop.f32.mrb[1].mxu1  ;;  %v1170_v32 = vsel %vm979_vm3, %v1020_v30, -inf }
 0x411   : > { %1171 = vmax.xlane.f32.xlu0 %v1170_v32  ;;  %v1023_v33 = vpop.f32.mrb[2].mxu1 }
 0x412   : > { %v2159_v34 = vpop.f32.mrb[3].mxu1 }
 0x47e   : > { %v1068_v35 = vpop.f32.mrb[4].mxu0 }
 0x47f   : > { %v2164_v36 = vpop.f32.mrb[5].mxu0  ;;  %v1173_v37 = vsel %vm979_vm3, %v1068_v35, -inf }
 0x480   : > { %1174 = vmax.xlane.f32.xlu1 %v1173_v37  ;;  %v1071_v38 = vpop.f32.mrb[6].mxu0  ;;  %v2406_v36 = vld [vmem:[%s713_s1] sm:$0xff]   ;;  %v2407_v37 = vld [vmem:[%s713_s1 + $0x8] sm:$0xff]  }
 0x481   : > { %v2165_v39 = vpop.f32.mrb[7].mxu0 }
 0x482   : > { %v1116_v40 = vpop.f32.mrb[4].mxu1 }
 0x483   : > { %v2170_v41 = vpop.f32.mrb[5].mxu1  ;;  %v1176_v42 = vsel %vm979_vm3, %v1116_v40, -inf }
 0x484   : > { %1177 = vmax.xlane.f32.xlu0 %v1176_v42  ;;  %v1119_v43 = vpop.f32.mrb[6].mxu1 }
 0x485   : > { %v2171_v44 = vpop.f32.mrb[7].mxu1 }
 0x486   : > { %v1164_v45 = vpop.f32.mrb[8].mxu0 }
 0x487   : > { %v2176_v46 = vpop.f32.mrb[9].mxu0  ;;  %v1179_v47 = vsel %vm979_vm3, %v1164_v45, -inf }
 0x488   : > { %1180 = vmax.xlane.f32.xlu0 %v1179_v47  ;;  %v1167_v48 = vpop.f32.mrb[10].mxu0 }
 0x489   : > { %v2177_v49 = vpop.f32.mrb[11].mxu0 }
 0x491   : > { %1218 = vrot.lane.b32.xlu1 %v3721_v12, %s2993_s25 }
 0x49e   : > { %v1172_v50 = vpop.xlane.xlu0 %1171 }
 0x49f   : > { %v1182_v51 = vsub.f32 %v1020_v30, %v1172_v50 }
 0x4a1   : > { %v1186_v52 = vmul.f32 1.442695, %v1182_v51 }
 0x4a3   : > { %2414 = vpow2.f32 %v1186_v52 }
 0x4ad   : > { %v2415_v53 = vpop.eup %2414 }
 0x4ae   : > { %v1194_v54 = vsel %vm979_vm3, %v2415_v53, 0.0 }
 0x4b5   : > { %1195 = vadd.xlane.f32.xlu1 %v1194_v54 }
 0x50d   : > { %v1175_v55 = vpop.xlane.xlu1 %1174 }
 0x50e   : > { %v1183_v56 = vsub.f32 %v1068_v35, %v1175_v55 }
 0x510   : > { %v1188_v57 = vmul.f32 1.442695, %v1183_v56 }
 0x511   : > { %v1178_v58 = vpop.xlane.xlu0 %1177  ;;  %v1219_v59 = vpop.permute.xlu1 %1218 }
 0x512   : > { %2416 = vpow2.f32 %v1188_v57  ;;  %v1184_v60 = vsub.f32 %v1116_v40, %v1178_v58  ;;  %v1225_v61 = vsel %vm1223_vm4, %v1219_v59, 0  ;;  %v2089_v57 = vld [vmem:[%s721_s9] ss:$0 sm:$0xff] }
 0x513   : > { %2179 = vmatpush3.bf16.msra.mxu1 %v1225_v61 }
 0x514   : > { %v1190_v62 = vmul.f32 1.442695, %v1184_v60  ;;  %2190 = vmatprep.subr.bf16.mxu1 %v2987_v3 }
 0x515   : > { %v1181_v63 = vpop.xlane.xlu0 %1180 }
 0x516   : > { %2418 = vpow2.f32 %v1190_v62  ;;  %v1185_v0 = vsub.f32 %v1164_v45, %v1181_v63 }
 0x518   : > { %v1192_v1 = vmul.f32 1.442695, %v1185_v0 }
 0x51a   : > { %2420 = vpow2.f32 %v1192_v1 }
 0x51c   : > { %v2417_v2 = vpop.eup %2416 }
 0x51d   : > { %v1197_v4 = vsel %vm979_vm3, %v2417_v2, 0.0 }
 0x51e   : > { %1198 = vadd.xlane.f32.xlu0 %v1197_v4 }
 0x520   : > { %v2419_v6 = vpop.eup %2418 }
 0x521   : > { %v1200_v7 = vsel %vm979_vm3, %v2419_v6, 0.0 }
 0x522   : > { %1201 = vadd.xlane.f32.xlu1 %v1200_v7 }
 0x524   : > { %v2421_v8 = vpop.eup %2420 }
 0x525   : > { %v1203_v9 = vsel %vm979_vm3, %v2421_v8, 0.0 }
 0x526   : > { %1204 = vadd.xlane.f32.xlu0 %v1203_v9  ;;  %v2410_v9 = vld [vmem:[%s3681_s27] sm:$0xff]  }
 0x533   : > { %1315 = vrot.lane.b32.xlu1 %v3732_v19, %s2993_s25 }
 0x537   : > { %1363 = vrot.lane.b32.xlu1 %v3727_v15, %s2993_s25 }
 0x53c   : > { %1267 = vrot.lane.b32.xlu0 %v3729_v16, %s2993_s25 }
 0x542   : > { %v1196_v10 = vpop.xlane.xlu1 %1195 }
 0x543   : > { %2422 = vrcp.f32 %v1196_v10  ;;  %v2411_v10 = vld [vmem:[%s3681_s27 + $0x8] sm:$0xff]  }
 0x54d   : > { %v2423_v11 = vpop.eup %2422 }
 0x54e   : > { %v1207_v12 = vmul.f32 %v2423_v11, %v2415_v53 }
 0x550   : > { %v1214_v13 = vpack.c.bf16 %v1207_v12, %v1207_v12 }
 0x552   : > { %2181 = vmatmul.mubr.msk.bf16.vlgmr.msra.gmra.mrb[8].mxu1 %vm979_vm3, %v1214_v13 }
 0x553   : > { %2192 = vmatprep.mubr.msk.bf16.mxu1 %vm2988_vm1, %v2987_v3 }
 0x5ab   : > { %v1199_v14 = vpop.xlane.xlu0 %1198 }
 0x5ac   : > { %2424 = vrcp.f32 %v1199_v14 }
 0x5af   : > { %v1202_v17 = vpop.xlane.xlu1 %1201 }
 0x5b0   : > { %2426 = vrcp.f32 %v1202_v17  ;;  %v2093_v17 = vld [vmem:[%s729_s15] ss:$0 sm:$0xff] }
 0x5b3   : > { %v1316_v18 = vpop.permute.xlu1 %1315  ;;  %v1205_v19 = vpop.xlane.xlu0 %1204 }
 0x5b4   : > { %v1321_v15 = vsel %vm1223_vm4, %v1316_v18, 0  ;;  %2428 = vrcp.f32 %v1205_v19  ;;  %v2094_v19 = vld [vmem:[%s737_s20] ss:$0 sm:$0xff] }
 0x5b5   : > { %2191 = vmatpush3.bf16.msra.mxu1 %v1321_v15 }
 0x5b6   : > { %v2425_v16 = vpop.eup %2424  ;;  %2202 = vmatprep.subr.bf16.mxu1 %v2987_v3 }
 0x5b7   : > { %v1209_v20 = vmul.f32 %v2425_v16, %v2417_v2  ;;  %v1268_v21 = vpop.permute.xlu0 %1267  ;;  %v1364_v23 = vpop.permute.xlu1 %1363 }
 0x5b8   : > { %v1273_v22 = vsel %vm1223_vm4, %v1268_v21, 0  ;;  %v1369_v27 = vsel %vm1223_vm4, %v1364_v23, 0  ;;  %v2412_v21 = vld [vmem:[%s3681_s27 + $0x10] sm:$0xff]   ;;  %v2095_v23 = vld [vmem:[%s754_s0] ss:$0 sm:$0xff] }
 0x5b9   : > { %2185 = vmatpush3.bf16.msra.mxu0 %v1273_v22  ;;  %v1215_v24 = vpack.c.bf16 %v1209_v20, %v1209_v20  ;;  %v2413_v22 = vld [vmem:[%s3681_s27 + $0x18] sm:$0xff]  }
 0x5ba   : > { %v2427_v25 = vpop.eup %2426  ;;  %2196 = vmatprep.subr.bf16.mxu0 %v2987_v3 }
 0x5bb   : > { %v1211_v26 = vmul.f32 %v2427_v25, %v2419_v6 }
 0x5bc   : > { %2187 = vmatmul.mubr.msk.bf16.vlgmr.msra.gmra.mrb[12].mxu0 %vm979_vm3, %v1215_v24 }
 0x5bd   : > { %2197 = vmatpush3.bf16.msra.mxu0 %v1369_v27  ;;  %v1216_v28 = vpack.c.bf16 %v1211_v26, %v1211_v26  ;;  %2198 = vmatprep.mubr.msk.bf16.mxu0 %vm2988_vm1, %v2987_v3 }
 0x5be   : > { %v2429_v29 = vpop.eup %2428  ;;  %2210 = vmatprep.subr.bf16.mxu0 %v2987_v3 }
 0x5bf   : > { %v1213_v30 = vmul.f32 %v2429_v29, %v2421_v8  ;;  %2193 = vmatmul.mubr.msk.bf16.vlgmr.msra.gmra.mrb[12].mxu1 %vm979_vm3, %v1216_v28  ;;  %v2408_v8 = vld [vmem:[%s746_s2] sm:$0xff]  }
 0x5c0   : > { %2206 = vmatprep.mubr.msk.bf16.mxu1 %vm2988_vm1, %v2987_v3  ;;  %2203 = vmatpush3.bf16.msra.mxu1 %v2406_v36 }
 0x5c1   : > { %v1217_v31 = vpack.c.bf16 %v1213_v30, %v1213_v30  ;;  %2204 = vmatprep.subr.bf16.mxu1 %v2987_v3 }
 0x5c4   : > { %2199 = vmatmul.mubr.msk.bf16.vlgmr.msra.gmra.mrb[16].mxu0 %vm979_vm3, %v1217_v31  ;;  %2205 = vmatpush3.bf16.msra.mxu1 %v2407_v37  ;;  %v2099_v31 = vld [vmem:[%s771_s21] ss:$0 sm:$0xff] }
 0x5c5   : > { %2214 = vmatprep.mubr.msk.bf16.mxu0 %vm2988_vm1, %v2987_v3  ;;  %2218 = vmatprep.subr.bf16.mxu1 %v2987_v3 }
 0x5c6   : > { %2211 = vmatpush3.bf16.msra.mxu0 %v2408_v8 }
 0x5c7   : > { %2212 = vmatprep.subr.bf16.mxu0 %v2987_v3 }
 0x625   : > { %v1261_v32 = vpop.f32.mrb[8].mxu1 }
 0x626   : > { %v2182_v33 = vpop.f32.mrb[9].mxu1 }
 0x627   : > { %v1264_v34 = vpop.f32.mrb[10].mxu1 }
 0x628   : > { %v2183_v35 = vpop.f32.mrb[11].mxu1 }
 0x68f   : > { %v1309_v38 = vpop.f32.mrb[12].mxu0 }
 0x690   : > { %1412 = vrot.lane.b32.xlu0 %v1309_v38, %s2994_s13  ;;  %v2188_v39 = vpop.f32.mrb[13].mxu0 }
 0x691   : > { %v1312_v40 = vpop.f32.mrb[14].mxu0 }
 0x692   : > { %v2189_v41 = vpop.f32.mrb[15].mxu0  ;;  %v1357_v42 = vpop.f32.mrb[12].mxu1 }
 0x693   : > { %1416 = vrot.lane.b32.xlu1 %v1357_v42, %s2995_s12  ;;  %v2194_v43 = vpop.f32.mrb[13].mxu1 }
 0x694   : > { %v1360_v44 = vpop.f32.mrb[14].mxu1 }
 0x695   : > { %v2195_v45 = vpop.f32.mrb[15].mxu1 }
 0x697   : > { %v1405_v46 = vpop.f32.mrb[16].mxu0 }
 0x698   : > { %1420 = vrot.lane.b32.xlu0 %v1405_v46, %s2996_s24  ;;  %v2200_v47 = vpop.f32.mrb[17].mxu0 }
 0x699   : > { %v1408_v48 = vpop.f32.mrb[18].mxu0  ;;  %v2105_v47 = vld [vmem:[%s779_s10] ss:$0 sm:$0xff] }
 0x69a   : > { %v2201_v49 = vpop.f32.mrb[19].mxu0 }
 0x69b   : > { %v2106_v49 = vld [vmem:[%s787_s11] ss:$0 sm:$0xff] }
 0x702   : > { %v1413_v50 = vpop.permute.xlu0 %1412 }
 0x703   : > { %v1423_v52 = vsel %vm979_vm3, %v1261_v32, %v1413_v50 }
 0x705   : > { %v1417_v51 = vpop.permute.xlu1 %1416 }
 0x706   : > { %v1425_v53 = vsel %vm1424_vm5, %v1423_v52, %v1417_v51 }
 0x70a   : > { %v1421_v54 = vpop.permute.xlu0 %1420 }
 0x70b   : > { %v1427_v55 = vsel %vm1426_vm6, %v1425_v53, %v1421_v54 }
 0x70c   : > { %v1428_v56 = vpack.c.bf16 %v1427_v55, %v1427_v55 }
 0x70e   : > { %2207 = vmatmul.mubr.msk.bf16.vlgmr.msra.gmra.mrb[16].mxu1 %vm916_vm2, %v1428_v56 }
 0x70f   : > { %2226 = vmatprep.mubr.msk.bf16.mxu1 %vm2988_vm1, %v2987_v3  ;;  %2219 = vmatpush3.bf16.msra.mxu1 %v2410_v9 }
 0x710   : > { %2220 = vmatprep.subr.bf16.mxu1 %v2987_v3 }
 0x713   : > { %2221 = vmatpush3.bf16.msra.mxu1 %v2411_v10 }
 0x714   : > { %2222 = vmatprep.subr.bf16.mxu1 %v2987_v3 }
 0x717   : > { %2223 = vmatpush3.bf16.msra.mxu1 %v2412_v21 }
 0x718   : > { %2224 = vmatprep.subr.bf16.mxu1 %v2987_v3 }
 0x71b   : > { %2225 = vmatpush3.bf16.msra.mxu1 %v2413_v22 }
 0x7e1   : > { %v1489_v58 = vpop.f32.mrb[16].mxu1 }
 0x7e2   : > { %v1490_v59 = vadd.f32 %v2089_v57, %v1489_v58  ;;  %v2208_v60 = vpop.f32.mrb[17].mxu1 }
 0x7e3   : > { %v1492_v61 = vpop.f32.mrb[18].mxu1 }
 0x7e4   : > { %v2209_v62 = vpop.f32.mrb[19].mxu1  ;;  %v1495_v63 = vadd.f32 %v1490_v59, %v3708_v5  ;;  %v2409_v5 = vld [vmem:[%s746_s2 + $0x8] sm:$0xff]  }
 0x7e5   : > { %2213 = vmatpush3.bf16.msra.mxu0 %v2409_v5 }
 0x7e6   : > { %v1498_v0 = vsel %vm916_vm2, %v1495_v63, 0.0 }
 0x7e7   : > { %1499 = vadd.xlane.f32.xlu1 %v1498_v0 }
 0x874   : > { %v1500_v1 = vpop.xlane.xlu1 %1499 }
 0x875   : > { %v1502_v2 = vmul.f32 0.03125, %v1500_v1 }
 0x877   : > { %v1503_v4 = vsub.f32 %v1495_v63, %v1502_v2 }
 0x879   : > { %v1504_v6 = vmul.f32 %v1503_v4, %v1503_v4 }
 0x87b   : > { %v1505_v7 = vsel %vm916_vm2, %v1504_v6, 0.0 }
 0x87c   : > { %1506 = vadd.xlane.f32.xlu0 %v1505_v7 }
 0x909   : > { %v1507_v11 = vpop.xlane.xlu0 %1506 }
 0x90a   : > { %v1508_v12 = vmul.f32 0.03125, %v1507_v11 }
 0x90c   : > { %v1509_v13 = vadd.f32 1e-05, %v1508_v12 }
 0x90e   : > { %2430 = vrsqrt.f32 %v1509_v13 }
 0x918   : > { %v2431_v14 = vpop.eup %2430 }
 0x919   : > { %v1511_v18 = vmul.f32 %v2431_v14, %v1503_v4 }
 0x91b   : > { %v1518_v15 = vmul.f32 %v2093_v17, %v1511_v18 }
 0x91d   : > { %v1525_v16 = vadd.f32 %v2094_v19, %v1518_v15 }
 0x91f   : > { %v1526_v20 = vpack.c.bf16 %v1525_v16, %v1525_v16 }
 0x921   : > { %2215 = vmatmul.mubr.msk.bf16.vlgmr.msra.gmra.mrb[20].mxu0 %vm916_vm2, %v1526_v20 }
 0x9f4   : > { %v1587_v24 = vpop.f32.mrb[20].mxu0 }
 0x9f5   : > { %v1588_v25 = vadd.f32 %v2095_v23, %v1587_v24  ;;  %v2216_v26 = vpop.f32.mrb[21].mxu0 }
 0x9f6   : > { %v1590_v27 = vpop.f32.mrb[22].mxu0 }
 0x9f7   : > { %v1593_v28 = vmax.f32 %v1588_v25, 0.0  ;;  %v2217_v29 = vpop.f32.mrb[23].mxu0 }
 0x9f9   : > { %v1594_v30 = vpack.c.bf16 %v1593_v28, %v1593_v28 }
 0x9fb   : > { %2227 = vmatmul.mubr.msk.bf16.vlgmr.msra.gmra.mrb[20].mxu1 %vm1634_vm7, %v1594_v30 }
 0xace   : > { %v1672_v32 = vpop.f32.mrb[20].mxu1 }
 0xacf   : > { %v1673_v33 = vadd.f32 %v2099_v31, %v1672_v32  ;;  %v2228_v34 = vpop.f32.mrb[21].mxu1 }
 0xad0   : > { %v1675_v35 = vpop.f32.mrb[22].mxu1 }
 0xad1   : > { %v2229_v3 = vpop.f32.mrb[23].mxu1  ;;  %v1678_v36 = vadd.f32 %v1673_v33, %v1525_v16 }
 0xad3   : > { %v1681_v37 = vsel %vm916_vm2, %v1678_v36, 0.0 }
 0xad4   : > { %1682 = vadd.xlane.f32.xlu0 %v1681_v37 }
 0xb61   : > { %v1683_v38 = vpop.xlane.xlu0 %1682 }
 0xb62   : > { %v1684_v39 = vmul.f32 0.03125, %v1683_v38 }
 0xb64   : > { %v1685_v40 = vsub.f32 %v1678_v36, %v1684_v39 }
 0xb66   : > { %v1686_v41 = vmul.f32 %v1685_v40, %v1685_v40 }
 0xb68   : > { %v1687_v42 = vsel %vm916_vm2, %v1686_v41, 0.0 }
 0xb69   : > { %1688 = vadd.xlane.f32.xlu1 %v1687_v42 }
 0xbf6   : > { %v1689_v43 = vpop.xlane.xlu1 %1688 }
 0xbf7   : > { %v1690_v44 = vmul.f32 0.03125, %v1689_v43 }
 0xbf9   : > { %v1691_v45 = vadd.f32 1e-05, %v1690_v44 }
 0xbfb   : > { %2432 = vrsqrt.f32 %v1691_v45 }
 0xc05   : > { %v2433_v46 = vpop.eup %2432 }
 0xc06   : > { %v1693_v48 = vmul.f32 %v2433_v46, %v1685_v40  ;;  %1712 = sbr.rel (%p2107_p11) target bundleno = 3085 (0xc0d), region = 132 }
 0xc08   : > { %v1700_v50 = vmul.f32 %v2105_v47, %v1693_v48 }
 0xc0a   : > { %v1707_v51 = vadd.f32 %v2106_v49, %v1700_v50 }
 0xc0c   : > { %1708 = vst.msk [vmem:[#allocation2] sm:$0xff] %vm916_vm2, %v1707_v51  ;;  %1713 = vst.msk [vmem:[%s3696_s17] sm:$0xff] (!%p2107_p11), %vm916_vm2, %v1707_v51 }
 0xc0d PF: > { %s4029_s1 = sld [smem:[#allocation38_spill]]  ;;  %s4030_s14 = sld [smem:[#allocation59_spill]] }
 0xc0e   : > { %s1728_s27 = sshll.u32 %s3696_s17, 4  ;;  %s1715_s21 = scalar_lea.sflag [#allocation5], %s3632_s23  ;;  %s1729_s27 = int_to_ptr.vmem [resolvable:$true] %s1728_s27 }
 0xc0f   : > { %s2824_s10 = scalar_lea.vmem %s1729_s27, 128  ;;  %p4032_p1 = scmp.ne.s32.totalorder %s3998_s5, 0 }
 0xc10   : > { %p2825_p2 = scmp.ne.s32.totalorder %s1729_s27, %s2824_s10  ;;  %s2997_s11 = smov [#allocation24]  }
 0xc11   : > { %s2828_s26 = sshll.u32 %s2997_s11, 4  ;;  %s2829_s26 = int_to_ptr.vmem [resolvable:$false] %s2828_s26 }
 0xc12   : > { %p2826_p8 = pnand %p2825_p2, %p4032_p1  ;;  %s2830_s8 = scalar_lea.vmem %s2829_s26, 256 }
 0xc13   : > { %s2109_s9 = sshll.u32 %s4029_s1, 7  ;;  %s4031_s2 = smov %s4030_s14 }
 0xc14   : > { %s3842_s0 = scalar_lea.hbm %s4030_s14, %s2109_s9  ;;  %p2827_p10 = pneg %p2826_p8 }
 0xc15   : > { %p2831_p9 = scmp.lt.s32.totalorder %s1729_s27, %s2829_s26  ;;  %p2832_p7 = scmp.lt.s32.totalorder %s2830_s8, %s2824_s10 }
 0xc17   : > { %p2833_p5 = por %p2832_p7, %p2831_p9 }
 0xc19   : > { %p2834_p3 = pnand %p2833_p5, %p2827_p10 }
 0xc1b   : > { %2837 = shalt.err (!%p2834_p3)
}
 0xc1c   : > { %s2838_s23 = scalar_lea.hbm %s3842_s0, 128  ;;  %s2842_s19 = scalar_lea.hbm %s4031_s2, 256 }
 0xc1d   : > { %p2839_p13 = scmp.ne.s32.totalorder %s3842_s0, %s2838_s23  ;;  %p2843_p12 = scmp.lt.u32.totalorder %s3842_s0, %s4031_s2 }
 0xc1e   : > { %p2844_p4 = scmp.lt.u32.totalorder %s2842_s19, %s2838_s23  ;;  %p2846_p2 = scmp.lt.u32.totalorder %s2838_s23, %s3842_s0 }
 0xc1f   : > { %p2840_p0 = pnand %p2839_p13, %p4032_p1 }
 0xc20   : > { %p2845_p11 = por %p2844_p4, %p2843_p12 }
 0xc21   : > { %p2841_p6 = pneg %p2840_p0 }
 0xc22   : > { %p2847_p8 = por %p2846_p2, %p2845_p11 }
 0xc24   : > { %p2848_p10 = pnand %p2847_p8, %p2841_p6 }
 0xc26   : > { %2851 = shalt.err (!%p2848_p10)
}
 0xc27   : > { %2256 = dma.vmem_to_hbm [thread:$0]  (%p4032_p1), %s1729_s27, 128, %s3842_s0, %s1715_s21  }
 0xc28 PF: > { %p2303_p9 = scmp.ge.s32.totalorder %s2970_s18, 2  ;;  %s1740_s13 = sand.u32 1, %s2942_s28  }
 0xc29   : > { %p4033_p7 = scmp.ne.s32.totalorder %s3999_s4, 0  ;;  %s1741_s12 = scalar_lea.sflag [#allocation5], %s1740_s13 }
 0xc2b   : > { %p2299_p5 = pnand %p2303_p9, %p4033_p7 }
 0xc2d   : > { %2925 = dma.done.wait (!%p2299_p5), %s1741_s12, 128  }
 0xc2e   : > { %2927 = vsyncadd (!%p2299_p5), %s1741_s12, 4294967168  ;;  %s47_s18 = sadd.s32 1, %s2970_s18   ;;  %s4034_s25 = sld [smem:[#allocation34_spill]] }
 0xc2f   : > { %p44_p3 = scmp.ge.s32.totalorder %s47_s18, 6   ;;  %s4035_s26 = sld [smem:[#allocation35_spill]] }
 0xc30   : > { %s4036_s27 = sld [smem:[#allocation44_spill]]  ;;  %s4037_s5 = sld [smem:[#allocation36_spill]] }
 0xc31   : > { %s4038_s30 = sld [smem:[#allocation45_spill]]  ;;  %s4039_s14 = sld [smem:[#allocation39_spill]] }
 0xc32   : > { %s4040_s15 = sld [smem:[#allocation40_spill]]  ;;  %s4041_s16 = sld [smem:[#allocation42_spill]] }
 0xc33   : > { %s4042_s17 = sld [smem:[#allocation43_spill]]  ;;  %s4043_s28 = smov %s2946_s29 }
 0xc34   :  { %46 = sbr.rel (!%p44_p3) target bundleno = 36 (0x24), region = 269 }
 0xc36   : > { %s4044_s29 = smov %s4037_s5 }
 0xc3b   :  { %1746 = vsyncpa [#allocation4], 1 }
 0xc3c   :  { %1748 = vsyncpa [#allocation4 + $0x1], 1 }
 0xc3d   :  { %1749 = vsyncpa [#allocation7], 1 }
 0xc3e   :  { %1751 = vsyncpa [#allocation7 + $0x1], 1 }
 0xc3f   :  { %1752 = vsyncpa [#allocation10], 1 }
 0xc40   :  { %1754 = vsyncpa [#allocation10 + $0x1], 1 }
 0xc41   :  { %1755 = vsyncpa [#allocation13], 1 }
 0xc42   :  { %1757 = vsyncpa [#allocation13 + $0x1], 1 }
 0xc43   :  { %1758 = vsyncpa [#allocation16], 1 }
 0xc44   :  { %1760 = vsyncpa [#allocation16 + $0x1], 1 }
 0xc45   :  { %1761 = vsyncpa [#allocation19], 1 }
 0xc46   :  { %1763 = vsyncpa [#allocation19 + $0x1], 1 }
 0xc47   :  { %1764 = vsyncpa [#allocation22], 1 }
 0xc48   :  { %1766 = vsyncpa [#allocation22 + $0x1], 1 }
 0xc49   :  { %1767 = vsyncpa [#allocation5], 1 }
 0xc4a   :  { %1769 = vsyncpa [#allocation5 + $0x1], 1 }

</bundles_post_ra>
